<compile_context>
chip_gen: v5e
topology: v5e:2x2
jax: 0.10.0
libtpu: 0.0.40
codegen_flags: <defaults>
</compile_context>

<pallas_src>
import jax
import jax.numpy as jnp
from jax import lax
from jax.experimental import pallas as pl
from jax.experimental.pallas import tpu as pltpu


def _sigmoid(x):
    return 1.0 / (1.0 + jnp.exp(-x))


# ------------------------- fused ResidualGroup kernel ------------------------

def _make_group_call(B, C, Cr, H, W, n_blocks, dtype):
    Hp, Wp = H + 2, W + 2
    P = Hp * Wp                 # flat padded spatial extent (the lane dim)
    MARGIN = Wp + 1             # slice-safety margin on each side of the scratch
    K9 = 9 * C

    def kernel(mask_ref, x_ref,
               w1s_ref, b1s_ref, w2s_ref, b2s_ref,
               wd1s_ref, bd1s_ref, wd2s_ref, bd2s_ref,
               wt_ref, bt_ref,
               o_ref, pad_ref):
        # Zero ONLY the slice-safety margins, once per image.  The interior
        # [MARGIN, MARGIN+P) is fully overwritten by every conv; the margins
        # are never written with data and are only read by border output
        # pixels, which the validity mask discards anyway.
        zm = jnp.zeros((C, MARGIN), jnp.bfloat16)
        pad_ref[:, 0:MARGIN] = zm
        pad_ref[:, MARGIN + P:MARGIN + P + MARGIN] = zm

        # Hoist the validity mask once (broadcasts are not CSE'd by JAX).
        valid = mask_ref[...] > 0.5                                 # (1, P) bool

        def conv3x3(act, w_bf16, bias_col):
            """3x3 'SAME' conv of one image in (C, P) flat-padded layout.

            act     : (C, P)  f32, zero at padded-border positions
            w_bf16  : (C, 9C) bf16  (rows = out channel, cols = tap*C + ci)
            bias_col: (C, 1)  f32
            returns : (C, P)  f32, zero at padded-border positions
            """
            # one bf16 cast + one dense lane-offset store per conv
            pad_ref[:, MARGIN:MARGIN + P] = act.astype(jnp.bfloat16)
            # 9 taps = 9 contiguous lane-offset slices; concat along the
            # contraction axis feeds ONE K=9C matmul (no im2col scratch).
            cols = jnp.concatenate(
                [pad_ref[:, dy * Wp + dx:dy * Wp + dx + P]
                 for dy in range(3) for dx in range(3)], axis=0)    # (9C, P) bf16
            raw = jnp.dot(w_bf16, cols,
                          preferred_element_type=jnp.float32)       # (C, P) f32
            # border outputs are garbage (they read the margins) -> select 0
            # so they keep acting as the zero padding of the next conv.
            return jnp.where(valid, raw + bias_col, 0.0)

        def rcab(i, act):
            h1 = jnp.maximum(conv3x3(act, w1s_ref[i], b1s_ref[i]), 0.0)
            h2 = conv3x3(h1, w2s_ref[i], b2s_ref[i])
            # channel attention: GAP over the H*W valid pixels + two 1x1 convs
            # (borders of h2 are exactly 0, so sum/(H*W) == mean over valid).
            y = jnp.sum(h2, axis=1, keepdims=True) * (1.0 / (H * W))    # (C, 1)
            z = jnp.maximum(
                jnp.sum(wd1s_ref[i] * y, axis=0, keepdims=True)
                + bd1s_ref[i], 0.0)                                     # (1, Cr)
            s = _sigmoid(
                jnp.sum(wd2s_ref[i] * z, axis=1, keepdims=True)
                + bd2s_ref[i])                                          # (C, 1)
            return h2 * s + act                                         # residual

        act = x_ref[0]                                              # (C, P) f32
        # Small static chain here.  TODO(synk): for deep groups move the block
        # index onto the grid ('arbitrary') and stream weights via index_maps.
        for i in range(n_blocks):
            act = rcab(i, act)

        # group residual: re-read x_ref instead of carrying it across the chain
        out = conv3x3(act, wt_ref[...], bt_ref[...]) + x_ref[0]
        o_ref[0] = out.astype(o_ref.dtype)

    def full(shape):
        return pl.BlockSpec(shape, lambda b, n=len(shape): (0,) * n)

    return pl.pallas_call(
        kernel,
        out_shape=jax.ShapeDtypeStruct((B, C, P), dtype),
        grid=(B,),
        in_specs=[
            full((1, P)),                                          # validity mask
            pl.BlockSpec((1, C, P), lambda b: (b, 0, 0)),          # x (flat padded)
            full((n_blocks, C, K9)), full((n_blocks, C, 1)),       # conv1 (bf16 w)
            full((n_blocks, C, K9)), full((n_blocks, C, 1)),       # conv2 (bf16 w)
            full((n_blocks, C, Cr)), full((n_blocks, 1, Cr)),      # CA down
            full((n_blocks, C, Cr)), full((n_blocks, C, 1)),       # CA up (pre-T)
            full((C, K9)), full((C, 1)),                           # tail conv
        ],
        out_specs=pl.BlockSpec((1, C, P), lambda b: (b, 0, 0)),
        scratch_shapes=[
            pltpu.VMEM((C, P + 2 * MARGIN), jnp.bfloat16),         # padded act
        ],
        compiler_params=pltpu.CompilerParams(
            dimension_semantics=("parallel",),      # v7x: 2 TCs share the batch
            # TODO(synk): make this generation-aware when scaling up
            # (~100 MiB usable on v5e/v6e, <=48-56 MiB on v7x).
            vmem_limit_bytes=48 * 1024 * 1024),
    )


# ------------------------------ wrapper / glue -------------------------------

def residual_group_pallas(x, params):
    """x: (B, C, H, W) float32 (NCHW, as in the PyTorch module)."""
    B, C, H, W = x.shape
    Hp, Wp = H + 2, W + 2
    P = Hp * Wp
    rcabs = params["rcabs"]
    n_blocks = len(rcabs)
    Cr = rcabs[0]["wd1"].shape[1]

    def conv_w(w):   # HWIO (3,3,Cin,Cout) -> (Cout, 9*Cin) bf16, tap-major cols
        return w.reshape(9 * C, C).T.astype(jnp.bfloat16)

    w1s = jnp.stack([conv_w(p["w1"]) for p in rcabs])              # (nb, C, 9C)
    b1s = jnp.stack([p["b1"].reshape(C, 1) for p in rcabs])
    w2s = jnp.stack([conv_w(p["w2"]) for p in rcabs])
    b2s = jnp.stack([p["b2"].reshape(C, 1) for p in rcabs])
    wd1s = jnp.stack([p["wd1"] for p in rcabs])                    # (nb, C, Cr)
    bd1s = jnp.stack([p["bd1"].reshape(1, Cr) for p in rcabs])
    wd2s = jnp.stack([p["wd2"].T for p in rcabs])                  # (nb, C, Cr)
    bd2s = jnp.stack([p["bd2"].reshape(C, 1) for p in rcabs])
    wt = conv_w(params["tail_w"])
    bt = params["tail_b"].reshape(C, 1)

    # lane-dense, zero-bordered flat layout (wrapper-side layout plumbing)
    x_flat = jnp.pad(x, ((0, 0), (0, 0), (1, 1), (1, 1))).reshape(B, C, P)
    mask = jnp.pad(jnp.ones((H, W), jnp.float32), ((1, 1), (1, 1))).reshape(1, P)

    call = _make_group_call(B, C, Cr, H, W, n_blocks, x.dtype)
    out_flat = call(mask, x_flat, w1s, b1s, w2s, b2s,
                    wd1s, bd1s, wd2s, bd2s, wt, bt)
    return out_flat.reshape(B, C, Hp, Wp)[:, :, 1:H + 1, 1:W + 1]


def init_params(key, n_feat, reduction, n_resblocks):
    # deterministic synthetic init (shapes match the PyTorch module)
    Cr = n_feat // reduction
    keys = iter(jax.random.split(key, n_resblocks * 8 + 2))

    def nrm(shape, scale=0.05):
        return scale * jax.random.normal(next(keys), shape, jnp.float32)

    rcabs = []
    for _ in range(n_resblocks):
        rcabs.append(dict(
            w1=nrm((3, 3, n_feat, n_feat)), b1=nrm((n_feat,)),
            w2=nrm((3, 3, n_feat, n_feat)), b2=nrm((n_feat,)),
            wd1=nrm((n_feat, Cr)), bd1=nrm((Cr,)),
            wd2=nrm((Cr, n_feat)), bd2=nrm((n_feat,)),
        ))
    return dict(rcabs=rcabs,
                tail_w=nrm((3, 3, n_feat, n_feat)),
                tail_b=nrm((n_feat,)))


# -------------------------- pure-JAX reference check -------------------------

def _conv3x3_ref(x, w, b):
    y = lax.conv_general_dilated(
        x, w, window_strides=(1, 1), padding="SAME",
        dimension_numbers=("NCHW", "HWIO", "NCHW"))
    return y + b.reshape(1, -1, 1, 1)


def _rcab_ref(x, p):
    h = jax.nn.relu(_conv3x3_ref(x, p["w1"], p["b1"]))
    h = _conv3x3_ref(h, p["w2"], p["b2"])
    y = jnp.mean(h, axis=(2, 3), keepdims=True)                       # (B,C,1,1)
    z = jax.nn.relu(jnp.einsum("bcij,cr->brij", y, p["wd1"])
                    + p["bd1"].reshape(1, -1, 1, 1))
    s = jax.nn.sigmoid(jnp.einsum("brij,rc->bcij", z, p["wd2"])
                       + p["bd2"].reshape(1, -1, 1, 1))
    return h * s + x


def residual_group_ref(x, params):
    h = x
    for p in params["rcabs"]:
        h = _rcab_ref(h, p)
    return _conv3x3_ref(h, params["tail_w"], params["tail_b"]) + x


# ------------------------------------ main -----------------------------------

if __name__ == "__main__":
    # small shapes: B=2, n_feat=16, reduction=4, H=W=16, kernel_size=3, 2 blocks
    n_feat, reduction, n_resblocks = 16, 4, 2
    B, H, W = 2, 16, 16

    key = jax.random.PRNGKey(0)
    kx, kp = jax.random.split(key)
    x = jax.random.normal(kx, (B, n_feat, H, W), jnp.float32)   # NCHW like PyTorch
    params = init_params(kp, n_feat, reduction, n_resblocks)

    out = jax.block_until_ready(residual_group_pallas(x, params))
    ref = residual_group_ref(x, params)

    assert out.shape == x.shape and out.dtype == x.dtype
    # kernel uses bf16 MXU operands (f32 accumulation); compare against the
    # f32 reference at a bf16-appropriate tolerance.
    max_err = float(jnp.max(jnp.abs(out - ref)))
    assert jnp.allclose(out, ref, atol=3e-2, rtol=3e-2), max_err
    print("KERNEL_OK")
</pallas_src>

<mosaic_0001>
module attributes {stable_mosaic.version = 11 : i64} {
  func.func @kernel(%arg0: i32, %arg1: memref<1x324xf32, #tpu.memory_space<vmem>>, %arg2: memref<1x16x324xf32, #tpu.memory_space<vmem>>, %arg3: memref<2x16x144xbf16, #tpu.memory_space<vmem>>, %arg4: memref<2x16x1xf32, #tpu.memory_space<vmem>>, %arg5: memref<2x16x144xbf16, #tpu.memory_space<vmem>>, %arg6: memref<2x16x1xf32, #tpu.memory_space<vmem>>, %arg7: memref<2x16x4xf32, #tpu.memory_space<vmem>>, %arg8: memref<2x1x4xf32, #tpu.memory_space<vmem>>, %arg9: memref<2x16x4xf32, #tpu.memory_space<vmem>>, %arg10: memref<2x16x1xf32, #tpu.memory_space<vmem>>, %arg11: memref<16x144xbf16, #tpu.memory_space<vmem>>, %arg12: memref<16x1xf32, #tpu.memory_space<vmem>>, %arg13: memref<1x16x324xf32, #tpu.memory_space<vmem>>, %arg14: memref<16x362xbf16, #tpu.memory_space<vmem>>) attributes {dimension_semantics = [#tpu.dimension_semantics<parallel>], iteration_bounds = array<i64: 2>, scalar_prefetch = 0 : i64, scratch_operands = 1 : i64, tpu.core_type = #tpu.core_type<tc>, window_params = [{pipeline_mode = #tpu.pipeline_mode<synchronous>, transform_indices = @transform_0, window_bounds = array<i64: 1, 324>}, {transform_indices = @transform_1, window_bounds = array<i64: 1, 16, 324>}, {pipeline_mode = #tpu.pipeline_mode<synchronous>, transform_indices = @transform_2, window_bounds = array<i64: 2, 16, 144>}, {pipeline_mode = #tpu.pipeline_mode<synchronous>, transform_indices = @transform_3, window_bounds = array<i64: 2, 16, 1>}, {pipeline_mode = #tpu.pipeline_mode<synchronous>, transform_indices = @transform_4, window_bounds = array<i64: 2, 16, 144>}, {pipeline_mode = #tpu.pipeline_mode<synchronous>, transform_indices = @transform_5, window_bounds = array<i64: 2, 16, 1>}, {pipeline_mode = #tpu.pipeline_mode<synchronous>, transform_indices = @transform_6, window_bounds = array<i64: 2, 16, 4>}, {pipeline_mode = #tpu.pipeline_mode<synchronous>, transform_indices = @transform_7, window_bounds = array<i64: 2, 1, 4>}, {pipeline_mode = #tpu.pipeline_mode<synchronous>, transform_indices = @transform_8, window_bounds = array<i64: 2, 16, 4>}, {pipeline_mode = #tpu.pipeline_mode<synchronous>, transform_indices = @transform_9, window_bounds = array<i64: 2, 16, 1>}, {pipeline_mode = #tpu.pipeline_mode<synchronous>, transform_indices = @transform_10, window_bounds = array<i64: 16, 144>}, {pipeline_mode = #tpu.pipeline_mode<synchronous>, transform_indices = @transform_11, window_bounds = array<i64: 16, 1>}, {transform_indices = @transform_12, window_bounds = array<i64: 1, 16, 324>}]} {
    %cst = arith.constant 0.000000e+00 : bf16
    %0 = vector.broadcast %cst : bf16 to vector<16x19xbf16>
    %c0 = arith.constant 0 : index
    %c0_0 = arith.constant 0 : index
    %1 = vector.load %arg14[%c0, %c0_0] : memref<16x362xbf16, #tpu.memory_space<vmem>>, vector<16x19xbf16>
    tpu.vector_store %arg14[%c0, %c0_0], %0 {strides = array<i32>} : memref<16x362xbf16, #tpu.memory_space<vmem>>, vector<16x19xbf16>,
    %c0_1 = arith.constant 0 : index
    %c343 = arith.constant 343 : index
    %2 = vector.load %arg14[%c0_1, %c343] : memref<16x362xbf16, #tpu.memory_space<vmem>>, vector<16x19xbf16>
    tpu.vector_store %arg14[%c0_1, %c343], %0 {strides = array<i32>} : memref<16x362xbf16, #tpu.memory_space<vmem>>, vector<16x19xbf16>,
    %c0_2 = arith.constant 0 : index
    %c0_3 = arith.constant 0 : index
    %3 = vector.load %arg1[%c0_2, %c0_3] : memref<1x324xf32, #tpu.memory_space<vmem>>, vector<1x324xf32>
    %cst_4 = arith.constant 5.000000e-01 : f32
    %4 = vector.broadcast %cst_4 : f32 to vector<1x324xf32>
    %5 = arith.cmpf ogt, %3, %4 : vector<1x324xf32>
    %c0_5 = arith.constant 0 : index
    %c0_6 = arith.constant 0 : index
    %c0_7 = arith.constant 0 : index
    %6 = vector.load %arg2[%c0_5, %c0_6, %c0_7] : memref<1x16x324xf32, #tpu.memory_space<vmem>>, vector<1x16x324xf32>
    %7 = vector.shape_cast %6 : vector<1x16x324xf32> to vector<16x324xf32>
    %c0_8 = arith.constant 0 : index
    %c0_9 = arith.constant 0 : index
    %c0_10 = arith.constant 0 : index
    %8 = vector.load %arg3[%c0_8, %c0_9, %c0_10] : memref<2x16x144xbf16, #tpu.memory_space<vmem>>, vector<1x16x144xbf16>
    %9 = vector.shape_cast %8 : vector<1x16x144xbf16> to vector<16x144xbf16>
    %c0_11 = arith.constant 0 : index
    %c0_12 = arith.constant 0 : index
    %c0_13 = arith.constant 0 : index
    %10 = vector.load %arg4[%c0_11, %c0_12, %c0_13] : memref<2x16x1xf32, #tpu.memory_space<vmem>>, vector<1x16x1xf32>
    %11 = vector.shape_cast %10 : vector<1x16x1xf32> to vector<16x1xf32>
    %12 = arith.truncf %7 : vector<16x324xf32> to vector<16x324xbf16>
    %c0_14 = arith.constant 0 : index
    %c19 = arith.constant 19 : index
    %13 = vector.load %arg14[%c0_14, %c19] : memref<16x362xbf16, #tpu.memory_space<vmem>>, vector<16x324xbf16>
    tpu.vector_store %arg14[%c0_14, %c19], %12 {strides = array<i32>} : memref<16x362xbf16, #tpu.memory_space<vmem>>, vector<16x324xbf16>,
    %c0_15 = arith.constant 0 : index
    %c0_16 = arith.constant 0 : index
    %14 = vector.load %arg14[%c0_15, %c0_16] : memref<16x362xbf16, #tpu.memory_space<vmem>>, vector<16x324xbf16>
    %c0_17 = arith.constant 0 : index
    %c1 = arith.constant 1 : index
    %15 = vector.load %arg14[%c0_17, %c1] : memref<16x362xbf16, #tpu.memory_space<vmem>>, vector<16x324xbf16>
    %c0_18 = arith.constant 0 : index
    %c2 = arith.constant 2 : index
    %16 = vector.load %arg14[%c0_18, %c2] : memref<16x362xbf16, #tpu.memory_space<vmem>>, vector<16x324xbf16>
    %c0_19 = arith.constant 0 : index
    %c18 = arith.constant 18 : index
    %17 = vector.load %arg14[%c0_19, %c18] : memref<16x362xbf16, #tpu.memory_space<vmem>>, vector<16x324xbf16>
    %c0_20 = arith.constant 0 : index
    %c19_21 = arith.constant 19 : index
    %18 = vector.load %arg14[%c0_20, %c19_21] : memref<16x362xbf16, #tpu.memory_space<vmem>>, vector<16x324xbf16>
    %c0_22 = arith.constant 0 : index
    %c20 = arith.constant 20 : index
    %19 = vector.load %arg14[%c0_22, %c20] : memref<16x362xbf16, #tpu.memory_space<vmem>>, vector<16x324xbf16>
    %c0_23 = arith.constant 0 : index
    %c36 = arith.constant 36 : index
    %20 = vector.load %arg14[%c0_23, %c36] : memref<16x362xbf16, #tpu.memory_space<vmem>>, vector<16x324xbf16>
    %c0_24 = arith.constant 0 : index
    %c37 = arith.constant 37 : index
    %21 = vector.load %arg14[%c0_24, %c37] : memref<16x362xbf16, #tpu.memory_space<vmem>>, vector<16x324xbf16>
    %c0_25 = arith.constant 0 : index
    %c38 = arith.constant 38 : index
    %22 = vector.load %arg14[%c0_25, %c38] : memref<16x362xbf16, #tpu.memory_space<vmem>>, vector<16x324xbf16>
    %23 = tpu.concatenate %14, %15, %16, %17, %18, %19, %20, %21, %22 in 0 : vector<16x324xbf16>, vector<16x324xbf16>, vector<16x324xbf16>, vector<16x324xbf16>, vector<16x324xbf16>, vector<16x324xbf16>, vector<16x324xbf16>, vector<16x324xbf16>, vector<16x324xbf16> -> vector<144x324xbf16>
    %cst_26 = arith.constant dense<0.000000e+00> : vector<16x324xf32>
    %24 = tpu.matmul %9, %23, %cst_26 {dimension_numbers = #tpu.dot_dimension_numbers<[1], [0], [0], [1], [0, 0, 1, 1], [], []>} : vector<16x144xbf16>, vector<144x324xbf16>, vector<16x324xf32> -> vector<16x324xf32>
    %25 = vector.broadcast %11 : vector<16x1xf32> to vector<16x324xf32>
    %26 = arith.addf %24, %25 : vector<16x324xf32>
    %cst_27 = arith.constant 0.000000e+00 : f32
    %27 = vector.shape_cast %5 : vector<1x324xi1> to vector<1x324xi1>
    %28 = vector.broadcast %27 : vector<1x324xi1> to vector<16x324xi1>
    %29 = vector.broadcast %cst_27 : f32 to vector<16x324xf32>
    %30 = arith.select %28, %26, %29 : vector<16x324xi1>, vector<16x324xf32>
    %cst_28 = arith.constant 0.000000e+00 : f32
    %31 = vector.broadcast %cst_28 : f32 to vector<16x324xf32>
    %32 = arith.maximumf %30, %31 : vector<16x324xf32>
    %c0_29 = arith.constant 0 : index
    %c0_30 = arith.constant 0 : index
    %c0_31 = arith.constant 0 : index
    %33 = vector.load %arg5[%c0_29, %c0_30, %c0_31] : memref<2x16x144xbf16, #tpu.memory_space<vmem>>, vector<1x16x144xbf16>
    %34 = vector.shape_cast %33 : vector<1x16x144xbf16> to vector<16x144xbf16>
    %c0_32 = arith.constant 0 : index
    %c0_33 = arith.constant 0 : index
    %c0_34 = arith.constant 0 : index
    %35 = vector.load %arg6[%c0_32, %c0_33, %c0_34] : memref<2x16x1xf32, #tpu.memory_space<vmem>>, vector<1x16x1xf32>
    %36 = vector.shape_cast %35 : vector<1x16x1xf32> to vector<16x1xf32>
    %37 = arith.truncf %32 : vector<16x324xf32> to vector<16x324xbf16>
    %c0_35 = arith.constant 0 : index
    %c19_36 = arith.constant 19 : index
    %38 = vector.load %arg14[%c0_35, %c19_36] : memref<16x362xbf16, #tpu.memory_space<vmem>>, vector<16x324xbf16>
    tpu.vector_store %arg14[%c0_35, %c19_36], %37 {strides = array<i32>} : memref<16x362xbf16, #tpu.memory_space<vmem>>, vector<16x324xbf16>,
    %c0_37 = arith.constant 0 : index
    %c0_38 = arith.constant 0 : index
    %39 = vector.load %arg14[%c0_37, %c0_38] : memref<16x362xbf16, #tpu.memory_space<vmem>>, vector<16x324xbf16>
    %c0_39 = arith.constant 0 : index
    %c1_40 = arith.constant 1 : index
    %40 = vector.load %arg14[%c0_39, %c1_40] : memref<16x362xbf16, #tpu.memory_space<vmem>>, vector<16x324xbf16>
    %c0_41 = arith.constant 0 : index
    %c2_42 = arith.constant 2 : index
    %41 = vector.load %arg14[%c0_41, %c2_42] : memref<16x362xbf16, #tpu.memory_space<vmem>>, vector<16x324xbf16>
    %c0_43 = arith.constant 0 : index
    %c18_44 = arith.constant 18 : index
    %42 = vector.load %arg14[%c0_43, %c18_44] : memref<16x362xbf16, #tpu.memory_space<vmem>>, vector<16x324xbf16>
    %c0_45 = arith.constant 0 : index
    %c19_46 = arith.constant 19 : index
    %43 = vector.load %arg14[%c0_45, %c19_46] : memref<16x362xbf16, #tpu.memory_space<vmem>>, vector<16x324xbf16>
    %c0_47 = arith.constant 0 : index
    %c20_48 = arith.constant 20 : index
    %44 = vector.load %arg14[%c0_47, %c20_48] : memref<16x362xbf16, #tpu.memory_space<vmem>>, vector<16x324xbf16>
    %c0_49 = arith.constant 0 : index
    %c36_50 = arith.constant 36 : index
    %45 = vector.load %arg14[%c0_49, %c36_50] : memref<16x362xbf16, #tpu.memory_space<vmem>>, vector<16x324xbf16>
    %c0_51 = arith.constant 0 : index
    %c37_52 = arith.constant 37 : index
    %46 = vector.load %arg14[%c0_51, %c37_52] : memref<16x362xbf16, #tpu.memory_space<vmem>>, vector<16x324xbf16>
    %c0_53 = arith.constant 0 : index
    %c38_54 = arith.constant 38 : index
    %47 = vector.load %arg14[%c0_53, %c38_54] : memref<16x362xbf16, #tpu.memory_space<vmem>>, vector<16x324xbf16>
    %48 = tpu.concatenate %39, %40, %41, %42, %43, %44, %45, %46, %47 in 0 : vector<16x324xbf16>, vector<16x324xbf16>, vector<16x324xbf16>, vector<16x324xbf16>, vector<16x324xbf16>, vector<16x324xbf16>, vector<16x324xbf16>, vector<16x324xbf16>, vector<16x324xbf16> -> vector<144x324xbf16>
    %cst_55 = arith.constant dense<0.000000e+00> : vector<16x324xf32>
    %49 = tpu.matmul %34, %48, %cst_55 {dimension_numbers = #tpu.dot_dimension_numbers<[1], [0], [0], [1], [0, 0, 1, 1], [], []>} : vector<16x144xbf16>, vector<144x324xbf16>, vector<16x324xf32> -> vector<16x324xf32>
    %50 = vector.broadcast %36 : vector<16x1xf32> to vector<16x324xf32>
    %51 = arith.addf %49, %50 : vector<16x324xf32>
    %cst_56 = arith.constant 0.000000e+00 : f32
    %52 = vector.shape_cast %5 : vector<1x324xi1> to vector<1x324xi1>
    %53 = vector.broadcast %52 : vector<1x324xi1> to vector<16x324xi1>
    %54 = vector.broadcast %cst_56 : f32 to vector<16x324xf32>
    %55 = arith.select %53, %51, %54 : vector<16x324xi1>, vector<16x324xf32>
    %cst_57 = arith.constant dense<0.000000e+00> : vector<16xf32>
    %56 = vector.multi_reduction <add>, %55, %cst_57 [1] : vector<16x324xf32> to vector<16xf32>
    %57 = vector.shape_cast %56 : vector<16xf32> to vector<16x1xf32>
    %cst_58 = arith.constant 3.906250e-03 : f32
    %58 = vector.broadcast %cst_58 : f32 to vector<16x1xf32>
    %59 = arith.mulf %57, %58 : vector<16x1xf32>
    %c0_59 = arith.constant 0 : index
    %c0_60 = arith.constant 0 : index
    %c0_61 = arith.constant 0 : index
    %60 = vector.load %arg7[%c0_59, %c0_60, %c0_61] : memref<2x16x4xf32, #tpu.memory_space<vmem>>, vector<1x16x4xf32>
    %61 = vector.shape_cast %60 : vector<1x16x4xf32> to vector<16x4xf32>
    %62 = vector.broadcast %59 : vector<16x1xf32> to vector<16x4xf32>
    %63 = arith.mulf %61, %62 : vector<16x4xf32>
    %cst_62 = arith.constant dense<0.000000e+00> : vector<4xf32>
    %64 = vector.multi_reduction <add>, %63, %cst_62 [0] : vector<16x4xf32> to vector<4xf32>
    %65 = vector.shape_cast %64 : vector<4xf32> to vector<1x4xf32>
    %c0_63 = arith.constant 0 : index
    %c0_64 = arith.constant 0 : index
    %c0_65 = arith.constant 0 : index
    %66 = vector.load %arg8[%c0_63, %c0_64, %c0_65] : memref<2x1x4xf32, #tpu.memory_space<vmem>>, vector<1x1x4xf32>
    %67 = vector.shape_cast %66 : vector<1x1x4xf32> to vector<1x4xf32>
    %68 = arith.addf %65, %67 : vector<1x4xf32>
    %cst_66 = arith.constant 0.000000e+00 : f32
    %69 = vector.broadcast %cst_66 : f32 to vector<1x4xf32>
    %70 = arith.maximumf %68, %69 : vector<1x4xf32>
    %c0_67 = arith.constant 0 : index
    %c0_68 = arith.constant 0 : index
    %c0_69 = arith.constant 0 : index
    %71 = vector.load %arg9[%c0_67, %c0_68, %c0_69] : memref<2x16x4xf32, #tpu.memory_space<vmem>>, vector<1x16x4xf32>
    %72 = vector.shape_cast %71 : vector<1x16x4xf32> to vector<16x4xf32>
    %73 = vector.broadcast %70 : vector<1x4xf32> to vector<16x4xf32>
    %74 = arith.mulf %72, %73 : vector<16x4xf32>
    %cst_70 = arith.constant dense<0.000000e+00> : vector<16xf32>
    %75 = vector.multi_reduction <add>, %74, %cst_70 [1] : vector<16x4xf32> to vector<16xf32>
    %76 = vector.shape_cast %75 : vector<16xf32> to vector<16x1xf32>
    %c0_71 = arith.constant 0 : index
    %c0_72 = arith.constant 0 : index
    %c0_73 = arith.constant 0 : index
    %77 = vector.load %arg10[%c0_71, %c0_72, %c0_73] : memref<2x16x1xf32, #tpu.memory_space<vmem>>, vector<1x16x1xf32>
    %78 = vector.shape_cast %77 : vector<1x16x1xf32> to vector<16x1xf32>
    %79 = arith.addf %76, %78 : vector<16x1xf32>
    %cst_74 = arith.constant 0.000000e+00 : f32
    %80 = vector.broadcast %cst_74 : f32 to vector<16x1xf32>
    %81 = arith.subf %80, %79 : vector<16x1xf32>
    %82 = math.exp %81 : vector<16x1xf32>
    %cst_75 = arith.constant 1.000000e+00 : f32
    %83 = vector.broadcast %cst_75 : f32 to vector<16x1xf32>
    %84 = arith.addf %83, %82 : vector<16x1xf32>
    %cst_76 = arith.constant 1.000000e+00 : f32
    %85 = vector.broadcast %cst_76 : f32 to vector<16x1xf32>
    %86 = arith.divf %85, %84 : vector<16x1xf32>
    %87 = vector.broadcast %86 : vector<16x1xf32> to vector<16x324xf32>
    %88 = arith.mulf %55, %87 : vector<16x324xf32>
    %89 = arith.addf %88, %7 : vector<16x324xf32>
    %c1_77 = arith.constant 1 : index
    %c0_78 = arith.constant 0 : index
    %c0_79 = arith.constant 0 : index
    %90 = vector.load %arg3[%c1_77, %c0_78, %c0_79] : memref<2x16x144xbf16, #tpu.memory_space<vmem>>, vector<1x16x144xbf16>
    %91 = vector.shape_cast %90 : vector<1x16x144xbf16> to vector<16x144xbf16>
    %c1_80 = arith.constant 1 : index
    %c0_81 = arith.constant 0 : index
    %c0_82 = arith.constant 0 : index
    %92 = vector.load %arg4[%c1_80, %c0_81, %c0_82] : memref<2x16x1xf32, #tpu.memory_space<vmem>>, vector<1x16x1xf32>
    %93 = vector.shape_cast %92 : vector<1x16x1xf32> to vector<16x1xf32>
    %94 = arith.truncf %89 : vector<16x324xf32> to vector<16x324xbf16>
    %c0_83 = arith.constant 0 : index
    %c19_84 = arith.constant 19 : index
    %95 = vector.load %arg14[%c0_83, %c19_84] : memref<16x362xbf16, #tpu.memory_space<vmem>>, vector<16x324xbf16>
    tpu.vector_store %arg14[%c0_83, %c19_84], %94 {strides = array<i32>} : memref<16x362xbf16, #tpu.memory_space<vmem>>, vector<16x324xbf16>,
    %c0_85 = arith.constant 0 : index
    %c0_86 = arith.constant 0 : index
    %96 = vector.load %arg14[%c0_85, %c0_86] : memref<16x362xbf16, #tpu.memory_space<vmem>>, vector<16x324xbf16>
    %c0_87 = arith.constant 0 : index
    %c1_88 = arith.constant 1 : index
    %97 = vector.load %arg14[%c0_87, %c1_88] : memref<16x362xbf16, #tpu.memory_space<vmem>>, vector<16x324xbf16>
    %c0_89 = arith.constant 0 : index
    %c2_90 = arith.constant 2 : index
    %98 = vector.load %arg14[%c0_89, %c2_90] : memref<16x362xbf16, #tpu.memory_space<vmem>>, vector<16x324xbf16>
    %c0_91 = arith.constant 0 : index
    %c18_92 = arith.constant 18 : index
    %99 = vector.load %arg14[%c0_91, %c18_92] : memref<16x362xbf16, #tpu.memory_space<vmem>>, vector<16x324xbf16>
    %c0_93 = arith.constant 0 : index
    %c19_94 = arith.constant 19 : index
    %100 = vector.load %arg14[%c0_93, %c19_94] : memref<16x362xbf16, #tpu.memory_space<vmem>>, vector<16x324xbf16>
    %c0_95 = arith.constant 0 : index
    %c20_96 = arith.constant 20 : index
    %101 = vector.load %arg14[%c0_95, %c20_96] : memref<16x362xbf16, #tpu.memory_space<vmem>>, vector<16x324xbf16>
    %c0_97 = arith.constant 0 : index
    %c36_98 = arith.constant 36 : index
    %102 = vector.load %arg14[%c0_97, %c36_98] : memref<16x362xbf16, #tpu.memory_space<vmem>>, vector<16x324xbf16>
    %c0_99 = arith.constant 0 : index
    %c37_100 = arith.constant 37 : index
    %103 = vector.load %arg14[%c0_99, %c37_100] : memref<16x362xbf16, #tpu.memory_space<vmem>>, vector<16x324xbf16>
    %c0_101 = arith.constant 0 : index
    %c38_102 = arith.constant 38 : index
    %104 = vector.load %arg14[%c0_101, %c38_102] : memref<16x362xbf16, #tpu.memory_space<vmem>>, vector<16x324xbf16>
    %105 = tpu.concatenate %96, %97, %98, %99, %100, %101, %102, %103, %104 in 0 : vector<16x324xbf16>, vector<16x324xbf16>, vector<16x324xbf16>, vector<16x324xbf16>, vector<16x324xbf16>, vector<16x324xbf16>, vector<16x324xbf16>, vector<16x324xbf16>, vector<16x324xbf16> -> vector<144x324xbf16>
    %cst_103 = arith.constant dense<0.000000e+00> : vector<16x324xf32>
    %106 = tpu.matmul %91, %105, %cst_103 {dimension_numbers = #tpu.dot_dimension_numbers<[1], [0], [0], [1], [0, 0, 1, 1], [], []>} : vector<16x144xbf16>, vector<144x324xbf16>, vector<16x324xf32> -> vector<16x324xf32>
    %107 = vector.broadcast %93 : vector<16x1xf32> to vector<16x324xf32>
    %108 = arith.addf %106, %107 : vector<16x324xf32>
    %cst_104 = arith.constant 0.000000e+00 : f32
    %109 = vector.shape_cast %5 : vector<1x324xi1> to vector<1x324xi1>
    %110 = vector.broadcast %109 : vector<1x324xi1> to vector<16x324xi1>
    %111 = vector.broadcast %cst_104 : f32 to vector<16x324xf32>
    %112 = arith.select %110, %108, %111 : vector<16x324xi1>, vector<16x324xf32>
    %cst_105 = arith.constant 0.000000e+00 : f32
    %113 = vector.broadcast %cst_105 : f32 to vector<16x324xf32>
    %114 = arith.maximumf %112, %113 : vector<16x324xf32>
    %c1_106 = arith.constant 1 : index
    %c0_107 = arith.constant 0 : index
    %c0_108 = arith.constant 0 : index
    %115 = vector.load %arg5[%c1_106, %c0_107, %c0_108] : memref<2x16x144xbf16, #tpu.memory_space<vmem>>, vector<1x16x144xbf16>
    %116 = vector.shape_cast %115 : vector<1x16x144xbf16> to vector<16x144xbf16>
    %c1_109 = arith.constant 1 : index
    %c0_110 = arith.constant 0 : index
    %c0_111 = arith.constant 0 : index
    %117 = vector.load %arg6[%c1_109, %c0_110, %c0_111] : memref<2x16x1xf32, #tpu.memory_space<vmem>>, vector<1x16x1xf32>
    %118 = vector.shape_cast %117 : vector<1x16x1xf32> to vector<16x1xf32>
    %119 = arith.truncf %114 : vector<16x324xf32> to vector<16x324xbf16>
    %c0_112 = arith.constant 0 : index
    %c19_113 = arith.constant 19 : index
    %120 = vector.load %arg14[%c0_112, %c19_113] : memref<16x362xbf16, #tpu.memory_space<vmem>>, vector<16x324xbf16>
    tpu.vector_store %arg14[%c0_112, %c19_113], %119 {strides = array<i32>} : memref<16x362xbf16, #tpu.memory_space<vmem>>, vector<16x324xbf16>,
    %c0_114 = arith.constant 0 : index
    %c0_115 = arith.constant 0 : index
    %121 = vector.load %arg14[%c0_114, %c0_115] : memref<16x362xbf16, #tpu.memory_space<vmem>>, vector<16x324xbf16>
    %c0_116 = arith.constant 0 : index
    %c1_117 = arith.constant 1 : index
    %122 = vector.load %arg14[%c0_116, %c1_117] : memref<16x362xbf16, #tpu.memory_space<vmem>>, vector<16x324xbf16>
    %c0_118 = arith.constant 0 : index
    %c2_119 = arith.constant 2 : index
    %123 = vector.load %arg14[%c0_118, %c2_119] : memref<16x362xbf16, #tpu.memory_space<vmem>>, vector<16x324xbf16>
    %c0_120 = arith.constant 0 : index
    %c18_121 = arith.constant 18 : index
    %124 = vector.load %arg14[%c0_120, %c18_121] : memref<16x362xbf16, #tpu.memory_space<vmem>>, vector<16x324xbf16>
    %c0_122 = arith.constant 0 : index
    %c19_123 = arith.constant 19 : index
    %125 = vector.load %arg14[%c0_122, %c19_123] : memref<16x362xbf16, #tpu.memory_space<vmem>>, vector<16x324xbf16>
    %c0_124 = arith.constant 0 : index
    %c20_125 = arith.constant 20 : index
    %126 = vector.load %arg14[%c0_124, %c20_125] : memref<16x362xbf16, #tpu.memory_space<vmem>>, vector<16x324xbf16>
    %c0_126 = arith.constant 0 : index
    %c36_127 = arith.constant 36 : index
    %127 = vector.load %arg14[%c0_126, %c36_127] : memref<16x362xbf16, #tpu.memory_space<vmem>>, vector<16x324xbf16>
    %c0_128 = arith.constant 0 : index
    %c37_129 = arith.constant 37 : index
    %128 = vector.load %arg14[%c0_128, %c37_129] : memref<16x362xbf16, #tpu.memory_space<vmem>>, vector<16x324xbf16>
    %c0_130 = arith.constant 0 : index
    %c38_131 = arith.constant 38 : index
    %129 = vector.load %arg14[%c0_130, %c38_131] : memref<16x362xbf16, #tpu.memory_space<vmem>>, vector<16x324xbf16>
    %130 = tpu.concatenate %121, %122, %123, %124, %125, %126, %127, %128, %129 in 0 : vector<16x324xbf16>, vector<16x324xbf16>, vector<16x324xbf16>, vector<16x324xbf16>, vector<16x324xbf16>, vector<16x324xbf16>, vector<16x324xbf16>, vector<16x324xbf16>, vector<16x324xbf16> -> vector<144x324xbf16>
    %cst_132 = arith.constant dense<0.000000e+00> : vector<16x324xf32>
    %131 = tpu.matmul %116, %130, %cst_132 {dimension_numbers = #tpu.dot_dimension_numbers<[1], [0], [0], [1], [0, 0, 1, 1], [], []>} : vector<16x144xbf16>, vector<144x324xbf16>, vector<16x324xf32> -> vector<16x324xf32>
    %132 = vector.broadcast %118 : vector<16x1xf32> to vector<16x324xf32>
    %133 = arith.addf %131, %132 : vector<16x324xf32>
    %cst_133 = arith.constant 0.000000e+00 : f32
    %134 = vector.shape_cast %5 : vector<1x324xi1> to vector<1x324xi1>
    %135 = vector.broadcast %134 : vector<1x324xi1> to vector<16x324xi1>
    %136 = vector.broadcast %cst_133 : f32 to vector<16x324xf32>
    %137 = arith.select %135, %133, %136 : vector<16x324xi1>, vector<16x324xf32>
    %cst_134 = arith.constant dense<0.000000e+00> : vector<16xf32>
    %138 = vector.multi_reduction <add>, %137, %cst_134 [1] : vector<16x324xf32> to vector<16xf32>
    %139 = vector.shape_cast %138 : vector<16xf32> to vector<16x1xf32>
    %cst_135 = arith.constant 3.906250e-03 : f32
    %140 = vector.broadcast %cst_135 : f32 to vector<16x1xf32>
    %141 = arith.mulf %139, %140 : vector<16x1xf32>
    %c1_136 = arith.constant 1 : index
    %c0_137 = arith.constant 0 : index
    %c0_138 = arith.constant 0 : index
    %142 = vector.load %arg7[%c1_136, %c0_137, %c0_138] : memref<2x16x4xf32, #tpu.memory_space<vmem>>, vector<1x16x4xf32>
    %143 = vector.shape_cast %142 : vector<1x16x4xf32> to vector<16x4xf32>
    %144 = vector.broadcast %141 : vector<16x1xf32> to vector<16x4xf32>
    %145 = arith.mulf %143, %144 : vector<16x4xf32>
    %cst_139 = arith.constant dense<0.000000e+00> : vector<4xf32>
    %146 = vector.multi_reduction <add>, %145, %cst_139 [0] : vector<16x4xf32> to vector<4xf32>
    %147 = vector.shape_cast %146 : vector<4xf32> to vector<1x4xf32>
    %c1_140 = arith.constant 1 : index
    %c0_141 = arith.constant 0 : index
    %c0_142 = arith.constant 0 : index
    %148 = vector.load %arg8[%c1_140, %c0_141, %c0_142] : memref<2x1x4xf32, #tpu.memory_space<vmem>>, vector<1x1x4xf32>
    %149 = vector.shape_cast %148 : vector<1x1x4xf32> to vector<1x4xf32>
    %150 = arith.addf %147, %149 : vector<1x4xf32>
    %cst_143 = arith.constant 0.000000e+00 : f32
    %151 = vector.broadcast %cst_143 : f32 to vector<1x4xf32>
    %152 = arith.maximumf %150, %151 : vector<1x4xf32>
    %c1_144 = arith.constant 1 : index
    %c0_145 = arith.constant 0 : index
    %c0_146 = arith.constant 0 : index
    %153 = vector.load %arg9[%c1_144, %c0_145, %c0_146] : memref<2x16x4xf32, #tpu.memory_space<vmem>>, vector<1x16x4xf32>
    %154 = vector.shape_cast %153 : vector<1x16x4xf32> to vector<16x4xf32>
    %155 = vector.broadcast %152 : vector<1x4xf32> to vector<16x4xf32>
    %156 = arith.mulf %154, %155 : vector<16x4xf32>
    %cst_147 = arith.constant dense<0.000000e+00> : vector<16xf32>
    %157 = vector.multi_reduction <add>, %156, %cst_147 [1] : vector<16x4xf32> to vector<16xf32>
    %158 = vector.shape_cast %157 : vector<16xf32> to vector<16x1xf32>
    %c1_148 = arith.constant 1 : index
    %c0_149 = arith.constant 0 : index
    %c0_150 = arith.constant 0 : index
    %159 = vector.load %arg10[%c1_148, %c0_149, %c0_150] : memref<2x16x1xf32, #tpu.memory_space<vmem>>, vector<1x16x1xf32>
    %160 = vector.shape_cast %159 : vector<1x16x1xf32> to vector<16x1xf32>
    %161 = arith.addf %158, %160 : vector<16x1xf32>
    %cst_151 = arith.constant 0.000000e+00 : f32
    %162 = vector.broadcast %cst_151 : f32 to vector<16x1xf32>
    %163 = arith.subf %162, %161 : vector<16x1xf32>
    %164 = math.exp %163 : vector<16x1xf32>
    %cst_152 = arith.constant 1.000000e+00 : f32
    %165 = vector.broadcast %cst_152 : f32 to vector<16x1xf32>
    %166 = arith.addf %165, %164 : vector<16x1xf32>
    %cst_153 = arith.constant 1.000000e+00 : f32
    %167 = vector.broadcast %cst_153 : f32 to vector<16x1xf32>
    %168 = arith.divf %167, %166 : vector<16x1xf32>
    %169 = vector.broadcast %168 : vector<16x1xf32> to vector<16x324xf32>
    %170 = arith.mulf %137, %169 : vector<16x324xf32>
    %171 = arith.addf %170, %89 : vector<16x324xf32>
    %c0_154 = arith.constant 0 : index
    %c0_155 = arith.constant 0 : index
    %172 = vector.load %arg11[%c0_154, %c0_155] : memref<16x144xbf16, #tpu.memory_space<vmem>>, vector<16x144xbf16>
    %c0_156 = arith.constant 0 : index
    %c0_157 = arith.constant 0 : index
    %173 = vector.load %arg12[%c0_156, %c0_157] : memref<16x1xf32, #tpu.memory_space<vmem>>, vector<16x1xf32>
    %174 = arith.truncf %171 : vector<16x324xf32> to vector<16x324xbf16>
    %c0_158 = arith.constant 0 : index
    %c19_159 = arith.constant 19 : index
    %175 = vector.load %arg14[%c0_158, %c19_159] : memref<16x362xbf16, #tpu.memory_space<vmem>>, vector<16x324xbf16>
    tpu.vector_store %arg14[%c0_158, %c19_159], %174 {strides = array<i32>} : memref<16x362xbf16, #tpu.memory_space<vmem>>, vector<16x324xbf16>,
    %c0_160 = arith.constant 0 : index
    %c0_161 = arith.constant 0 : index
    %176 = vector.load %arg14[%c0_160, %c0_161] : memref<16x362xbf16, #tpu.memory_space<vmem>>, vector<16x324xbf16>
    %c0_162 = arith.constant 0 : index
    %c1_163 = arith.constant 1 : index
    %177 = vector.load %arg14[%c0_162, %c1_163] : memref<16x362xbf16, #tpu.memory_space<vmem>>, vector<16x324xbf16>
    %c0_164 = arith.constant 0 : index
    %c2_165 = arith.constant 2 : index
    %178 = vector.load %arg14[%c0_164, %c2_165] : memref<16x362xbf16, #tpu.memory_space<vmem>>, vector<16x324xbf16>
    %c0_166 = arith.constant 0 : index
    %c18_167 = arith.constant 18 : index
    %179 = vector.load %arg14[%c0_166, %c18_167] : memref<16x362xbf16, #tpu.memory_space<vmem>>, vector<16x324xbf16>
    %c0_168 = arith.constant 0 : index
    %c19_169 = arith.constant 19 : index
    %180 = vector.load %arg14[%c0_168, %c19_169] : memref<16x362xbf16, #tpu.memory_space<vmem>>, vector<16x324xbf16>
    %c0_170 = arith.constant 0 : index
    %c20_171 = arith.constant 20 : index
    %181 = vector.load %arg14[%c0_170, %c20_171] : memref<16x362xbf16, #tpu.memory_space<vmem>>, vector<16x324xbf16>
    %c0_172 = arith.constant 0 : index
    %c36_173 = arith.constant 36 : index
    %182 = vector.load %arg14[%c0_172, %c36_173] : memref<16x362xbf16, #tpu.memory_space<vmem>>, vector<16x324xbf16>
    %c0_174 = arith.constant 0 : index
    %c37_175 = arith.constant 37 : index
    %183 = vector.load %arg14[%c0_174, %c37_175] : memref<16x362xbf16, #tpu.memory_space<vmem>>, vector<16x324xbf16>
    %c0_176 = arith.constant 0 : index
    %c38_177 = arith.constant 38 : index
    %184 = vector.load %arg14[%c0_176, %c38_177] : memref<16x362xbf16, #tpu.memory_space<vmem>>, vector<16x324xbf16>
    %185 = tpu.concatenate %176, %177, %178, %179, %180, %181, %182, %183, %184 in 0 : vector<16x324xbf16>, vector<16x324xbf16>, vector<16x324xbf16>, vector<16x324xbf16>, vector<16x324xbf16>, vector<16x324xbf16>, vector<16x324xbf16>, vector<16x324xbf16>, vector<16x324xbf16> -> vector<144x324xbf16>
    %cst_178 = arith.constant dense<0.000000e+00> : vector<16x324xf32>
    %186 = tpu.matmul %172, %185, %cst_178 {dimension_numbers = #tpu.dot_dimension_numbers<[1], [0], [0], [1], [0, 0, 1, 1], [], []>} : vector<16x144xbf16>, vector<144x324xbf16>, vector<16x324xf32> -> vector<16x324xf32>
    %187 = vector.broadcast %173 : vector<16x1xf32> to vector<16x324xf32>
    %188 = arith.addf %186, %187 : vector<16x324xf32>
    %cst_179 = arith.constant 0.000000e+00 : f32
    %189 = vector.shape_cast %5 : vector<1x324xi1> to vector<1x324xi1>
    %190 = vector.broadcast %189 : vector<1x324xi1> to vector<16x324xi1>
    %191 = vector.broadcast %cst_179 : f32 to vector<16x324xf32>
    %192 = arith.select %190, %188, %191 : vector<16x324xi1>, vector<16x324xf32>
    %c0_180 = arith.constant 0 : index
    %c0_181 = arith.constant 0 : index
    %c0_182 = arith.constant 0 : index
    %193 = vector.load %arg2[%c0_180, %c0_181, %c0_182] : memref<1x16x324xf32, #tpu.memory_space<vmem>>, vector<1x16x324xf32>
    %194 = vector.shape_cast %193 : vector<1x16x324xf32> to vector<16x324xf32>
    %195 = arith.addf %192, %194 : vector<16x324xf32>
    %c0_183 = arith.constant 0 : index
    %c0_184 = arith.constant 0 : index
    %c0_185 = arith.constant 0 : index
    %196 = vector.load %arg13[%c0_183, %c0_184, %c0_185] : memref<1x16x324xf32, #tpu.memory_space<vmem>>, vector<1x16x324xf32>
    %197 = vector.shape_cast %196 : vector<1x16x324xf32> to vector<16x324xf32>
    %198 = vector.shape_cast %195 : vector<16x324xf32> to vector<1x16x324xf32>
    tpu.vector_store %arg13[%c0_183, %c0_184, %c0_185], %198 {strides = array<i32>} : memref<1x16x324xf32, #tpu.memory_space<vmem>>, vector<1x16x324xf32>,
    return
  }
  func.func @transform_0(%arg0: i32) -> (i32, i32) {
    %c0_i32 = arith.constant 0 : i32
    %c0_i32_0 = arith.constant 0 : i32
    %c0_i32_1 = arith.constant 0 : i32
    return %c0_i32, %c0_i32_0 : i32, i32
  }
  func.func @transform_1(%arg0: i32) -> (i32, i32, i32) {
    %c0_i32 = arith.constant 0 : i32
    %c0_i32_0 = arith.constant 0 : i32
    %c0_i32_1 = arith.constant 0 : i32
    return %arg0, %c0_i32, %c0_i32_0 : i32, i32, i32
  }
  func.func @transform_2(%arg0: i32) -> (i32, i32, i32) {
    %c0_i32 = arith.constant 0 : i32
    %c0_i32_0 = arith.constant 0 : i32
    %c0_i32_1 = arith.constant 0 : i32
    %c0_i32_2 = arith.constant 0 : i32
    return %c0_i32, %c0_i32_0, %c0_i32_1 : i32, i32, i32
  }
  func.func @transform_3(%arg0: i32) -> (i32, i32, i32) {
    %c0_i32 = arith.constant 0 : i32
    %c0_i32_0 = arith.constant 0 : i32
    %c0_i32_1 = arith.constant 0 : i32
    %c0_i32_2 = arith.constant 0 : i32
    return %c0_i32, %c0_i32_0, %c0_i32_1 : i32, i32, i32
  }
  func.func @transform_4(%arg0: i32) -> (i32, i32, i32) {
    %c0_i32 = arith.constant 0 : i32
    %c0_i32_0 = arith.constant 0 : i32
    %c0_i32_1 = arith.constant 0 : i32
    %c0_i32_2 = arith.constant 0 : i32
    return %c0_i32, %c0_i32_0, %c0_i32_1 : i32, i32, i32
  }
  func.func @transform_5(%arg0: i32) -> (i32, i32, i32) {
    %c0_i32 = arith.constant 0 : i32
    %c0_i32_0 = arith.constant 0 : i32
    %c0_i32_1 = arith.constant 0 : i32
    %c0_i32_2 = arith.constant 0 : i32
    return %c0_i32, %c0_i32_0, %c0_i32_1 : i32, i32, i32
  }
  func.func @transform_6(%arg0: i32) -> (i32, i32, i32) {
    %c0_i32 = arith.constant 0 : i32
    %c0_i32_0 = arith.constant 0 : i32
    %c0_i32_1 = arith.constant 0 : i32
    %c0_i32_2 = arith.constant 0 : i32
    return %c0_i32, %c0_i32_0, %c0_i32_1 : i32, i32, i32
  }
  func.func @transform_7(%arg0: i32) -> (i32, i32, i32) {
    %c0_i32 = arith.constant 0 : i32
    %c0_i32_0 = arith.constant 0 : i32
    %c0_i32_1 = arith.constant 0 : i32
    %c0_i32_2 = arith.constant 0 : i32
    return %c0_i32, %c0_i32_0, %c0_i32_1 : i32, i32, i32
  }
  func.func @transform_8(%arg0: i32) -> (i32, i32, i32) {
    %c0_i32 = arith.constant 0 : i32
    %c0_i32_0 = arith.constant 0 : i32
    %c0_i32_1 = arith.constant 0 : i32
    %c0_i32_2 = arith.constant 0 : i32
    return %c0_i32, %c0_i32_0, %c0_i32_1 : i32, i32, i32
  }
  func.func @transform_9(%arg0: i32) -> (i32, i32, i32) {
    %c0_i32 = arith.constant 0 : i32
    %c0_i32_0 = arith.constant 0 : i32
    %c0_i32_1 = arith.constant 0 : i32
    %c0_i32_2 = arith.constant 0 : i32
    return %c0_i32, %c0_i32_0, %c0_i32_1 : i32, i32, i32
  }
  func.func @transform_10(%arg0: i32) -> (i32, i32) {
    %c0_i32 = arith.constant 0 : i32
    %c0_i32_0 = arith.constant 0 : i32
    %c0_i32_1 = arith.constant 0 : i32
    return %c0_i32, %c0_i32_0 : i32, i32
  }
  func.func @transform_11(%arg0: i32) -> (i32, i32) {
    %c0_i32 = arith.constant 0 : i32
    %c0_i32_0 = arith.constant 0 : i32
    %c0_i32_1 = arith.constant 0 : i32
    return %c0_i32, %c0_i32_0 : i32, i32
  }
  func.func @transform_12(%arg0: i32) -> (i32, i32, i32) {
    %c0_i32 = arith.constant 0 : i32
    %c0_i32_0 = arith.constant 0 : i32
    %c0_i32_1 = arith.constant 0 : i32
    return %arg0, %c0_i32, %c0_i32_0 : i32, i32, i32
  }
}

</mosaic_0001>

<bundles_post_ra>
// kernel: tpu_custom_call.1
= control target key start
LH: loop header
LB: loop body
LE: loop exit
PB: predicated region body
PF: predicated region fallthrough
CT: control target
= control target key end

     0   :  { %s3425_s0 = inlined_call_operand.vmem [shape: f32[1,324], index: 0, kind: input, shape index: {}]   ;;  %s3426_s1 = inlined_call_operand.hbm [shape: f32[2,16,324], index: 1, kind: input, shape index: {}]   ;;  %s3427_s2 = inlined_call_operand.vmem [shape: bf16[2,16,144], index: 2, kind: input, shape index: {}]   ;;  %s3428_s3 = inlined_call_operand.vmem [shape: f32[2,16,1], index: 3, kind: input, shape index: {}]   ;;  %s3429_s4 = inlined_call_operand.vmem [shape: bf16[2,16,144], index: 4, kind: input, shape index: {}]   ;;  %s3430_s5 = inlined_call_operand.vmem [shape: f32[2,16,1], index: 5, kind: input, shape index: {}]   ;;  %s3431_s6 = inlined_call_operand.vmem [shape: f32[2,16,4], index: 6, kind: input, shape index: {}]   ;;  %s3432_s7 = inlined_call_operand.vmem [shape: f32[2,1,4], index: 7, kind: input, shape index: {}]   ;;  %s3433_s8 = inlined_call_operand.vmem [shape: f32[2,16,4], index: 8, kind: input, shape index: {}]   ;;  %s3434_s9 = inlined_call_operand.vmem [shape: f32[2,16,1], index: 9, kind: input, shape index: {}]   ;;  %s3435_s10 = inlined_call_operand.vmem [shape: bf16[16,144], index: 10, kind: input, shape index: {}]   ;;  %s3436_s11 = inlined_call_operand.vmem [shape: f32[16,1], index: 11, kind: input, shape index: {}]   ;;  %s3437_s12 = inlined_call_operand.hbm [shape: f32[2,16,324], index: 12, kind: output, shape index: {}]  }
   0x1   :  { %3472 = sst [smem:[#allocation15_spill]] %s3437_s12 }
   0x2   :  { %17 = vsyncpa [#allocation4], 0 }
   0x3   :  { %19 = vsyncpa [#allocation4 + $0x1], 0 }
   0x4   :  { %20 = vsyncpa [#allocation5], 0 }
   0x5   :  { %22 = vsyncpa [#allocation5 + $0x1], 0  ;;  %s2498_s21 = smov 0   ;;  %s2500_s22 = smov 0  }
   0x6   :  { %s2502_s23 = smov 0   ;;  %s2504_s24 = smov 0  }
   0x7 LB: > { %3473 = sst [smem:[#allocation9_spill]] %s2405_s21  ;;  %s2519_s25 = sadd.s32 4294967295, %s2417_s24   ;;  %s2417_s24 = sphi %s2504_s24, %s3556_s24   ;;  %s2413_s23 = sphi %s2502_s23, %s3558_s23   ;;  %s2409_s22 = sphi %s2500_s22, %s3560_s22   ;;  %s2405_s21 = sphi %s2498_s21, %s3559_s21  }
   0x8   : > { %3474 = sst [smem:[#allocation10_spill]] %s2413_s23  ;;  %s2075_s26 = sadd.s32 4294967294, %s2417_s24  }
   0x9   : > { %s2523_s27 = sadd.s32 1, %s2417_s24   ;;  %s56_s28 = sadd.s32 1, %s2413_s23 }
   0xa   : > { %3475 = sst [smem:[#allocation11_spill]] %s2523_s27  ;;  %s53_s29 = ssub.s32 %s2417_s24, %s2523_s27 }
   0xb   : > { %p63_p0 = scmp.ne.s32.totalorder %s2413_s23, %s2409_s22  ;;  %p54_p1 = scmp.eq.s32.totalorder %s53_s29, 0 }
   0xc   : > { %p64_p2 = scmp.eq.s32.totalorder %s2417_s24, 0  ;;  %p69_p3 = scmp.ne.s32.totalorder %s2409_s22, %s2405_s21 }
   0xd   : > { %p70_p4 = scmp.eq.s32.totalorder %s2519_s25, 0  ;;  %p303_p7 = scmp.eq.s32.totalorder %s2519_s25, 1 }
   0xe   : > { %s2535_s30 = scalar_select %p54_p1, %s2413_s23, %s56_s28  }
   0xf   : > { %p65_p5 = por %p64_p2, %p63_p0  ;;  %p2537_p6 = por %p70_p4, %p69_p3 }
  0x10   : > { %3476 = sst [smem:[#allocation12_spill]] %s2535_s30  ;;  %p309_p8 = scmp.eq.s32.totalorder %s2075_s26, 1 }
  0x11   : > { %p2077_p9 = scmp.ge.s32.totalorder %s2417_s24, 2  ;;  %p2254_p10 = scmp.lt.s32.totalorder %s2417_s24, 2 }
  0x12   : > { %p2544_p11 = por %p303_p7, %p63_p0  ;;  %p2548_p12 = por %p309_p8, %p69_p3 }
  0x13   : > { %s362_s16 = sand.u32 1, %s2413_s23   ;;  %s2239_s17 = smul.u32 48, %s2417_s24 }
  0x14   : > { %s3478_s14 = scalar_select %p2544_p11, 1, 0 }
  0x15   : > { %s3480_s15 = scalar_select %p2548_p12, 1, 0 }
  0x16   : > { %3479 = sst [smem:[#allocation13_spill]] %s3478_s14  ;;  %s2238_s18 = smul.u32 48, %s362_s16 }
  0x17   : > { %3481 = sst [smem:[#allocation14_spill]] %s3480_s15  ;;  %s371_s28 = scalar_lea.hbm %s3426_s1, %s2239_s17 }
  0x18   : > { %p2557_p13 = pnand %p2254_p10, %p65_p5  ;;  %s372_s26 = sshll.u32 %s371_s28, 4  ;;  %s373_s26 = int_to_ptr.hbm [resolvable:$true] %s372_s26 }
  0x19   : > { %s366_s30 = scalar_lea.vmem [#allocation3], %s2238_s18  ;;  %s363_s21 = scalar_lea.sflag [#allocation4], %s362_s16 }
  0x1a   : > { %s374_s27 = sshll.u32 %s366_s30, 4  ;;  %s2321_s14 = sshra.s32 %s373_s26, 4  ;;  %s375_s27 = int_to_ptr.vmem [resolvable:$true] %s374_s27  ;;  %s2322_s14 = int_to_ptr.hbm [resolvable:$true] %s2321_s14 }
  0x1b   : > { %s2323_s23 = scalar_lea.hbm %s2322_s14, 48  ;;  %p2325_p1 = pneg %p2557_p13 }
  0x1c   : > { %p2324_p0 = scmp.ne.s32.totalorder %s2322_s14, %s2323_s23  ;;  %s2328_s20 = scalar_lea.hbm %s3426_s1, 96 }
  0x1d   : > { %p2329_p4 = scmp.lt.s32.totalorder %s2322_s14, %s3426_s1  ;;  %p2330_p5 = scmp.lt.s32.totalorder %s2328_s20, %s2323_s23 }
  0x1e   : > { %p2326_p2 = pnand %p2325_p1, %p2324_p0 }
  0x1f   : > { %p2331_p7 = por %p2330_p5, %p2329_p4 }
  0x20   : > { %p2327_p3 = pneg %p2326_p2 }
  0x22   : > { %p2332_p8 = pnand %p2331_p7, %p2327_p3 }
  0x24   : > { %2335 = shalt.err (!%p2332_p8)
}
  0x25   : > { %s2419_s30 = smov 384   ;;  %s2420_s16 = smov 24  }
  0x26   : > { %2249 = dma.hbm_to_vmem [thread:$0]  (!%p2557_p13), %s373_s26, 768, %s375_s27, %s363_s21, %s2419_s30, %s2419_s30, %s2420_s16  }
  0x27   : > { %p2079_p10 = scmp.ge.s32.totalorder %s2417_s24, 1  ;;  %p382_p0 = scmp.lt.s32.totalorder %s2417_s24, 3 }
  0x29   : > { %p383_p1 = pnand %p2079_p10, %p382_p0 }
  0x2a   : > { %s2574_s18 = sand.u32 (!%p383_p1), 1, %s2409_s22  }
  0x2b   : > { %386 = sbr.rel (%p383_p1) target bundleno = 3204 (0xc84), region = 68  ;;  %s389_s23 = scalar_lea.sflag (!%p383_p1), [#allocation4], %s2574_s18 }
  0x2c   : > { %s3446_s12 = smul.u32 (!%p383_p1), 48, %s2574_s18 }
  0x2e   : > { %s2580_s14 = scalar_lea.vmem (!%p383_p1), [#allocation3], %s3446_s12 }
  0x30   : > { %2396 = dma.done.wait (%p2537_p6), %s389_s23, 768  }
  0x31   : > { %2398 = vsyncadd (%p2537_p6), %s389_s23, 4294966528  ;;  %vm435_vm0 = vcmask 150528   ;;  %v2421_v0 = vmov 0   ;;  %v2592_v1 = vld [vmem:[%s2580_s14] sm:$0xff]  ;;  %v2595_v2 = vld [vmem:[%s2580_s14 + $0x8] sm:$0xff]  ;;  %s2422_s21 = smov 19  }
  0x32   : > { %436 = vst.msk [vmem:[#allocation2] sm:$0xf] %vm435_vm0, %v2421_v0  ;;  %2302 = vset.pattern.permute.xlu1 %v2421_v0  ;;  %2303 = vset.pattern.permute.xlu2 %v2421_v0  ;;  %v2598_v3 = vld [vmem:[%s2580_s14 + $0x10] sm:$0xff]  ;;  %v453_v4 = vpack.c.bf16 %v2595_v2, %v2592_v1  ;;  %v2607_v6 = vld [vmem:[%s2580_s14 + $0x18] sm:$0xff]  ;;  %v2610_v7 = vld [vmem:[%s2580_s14 + $0x20] sm:$0xff]  ;;  %vm438_vm1 = vcmask 863928  }
  0x33   : > { %437 = vst.msk [vmem:[#allocation2 + $0xc] sm:$0xf] %vm435_vm0, %v2421_v0  ;;  %2304 = vset.pattern.permute.xlu0 %v2421_v0  ;;  %v454_v5 = vpack.c.bf16 %v2598_v3, %v2598_v3  ;;  %v2613_v8 = vld [vmem:[%s2580_s14 + $0x28] sm:$0xff]  ;;  %v455_v9 = vpack.c.bf16 %v2610_v7, %v2607_v6  ;;  %vm480_vm2 = vcmask 1043608   ;;  %vm481_vm3 = vcmask 1047556   ;;  %s3470_s27 = smov 92  }
  0x34   : > { %461 = vrot.lane.b32.xlu0 %v453_v4, %s2422_s21  ;;  %v456_v10 = vpack.c.bf16 %v2613_v8, %v2613_v8  ;;  %439 = vst.msk [vmem:[#allocation2 + $0x8] sm:$0xf] %vm438_vm1, %v2421_v0  ;;  %vm471_vm4 = vcmask 154624   ;;  %vm2623_vm5 = vmor %vm481_vm3, %vm480_vm2  ;;  %vm484_vm6 = vcmask 707584   ;;  %s3468_s13 = smov 91   ;;  %s3466_s15 = smov 108  }
  0x35   : > { %463 = vrot.lane.b32.xlu1 %v454_v5, %s2422_s21  ;;  %440 = vst.msk [vmem:[#allocation2 + $0x14] sm:$0xf] %vm438_vm1, %v2421_v0  ;;  %s3464_s28 = smov 109   ;;  %s3462_s29 = smov 110   ;;  %vm586_vm7 = vcmask 744448   ;;  %vm574_vm8 = vcmask 752640  }
  0x36   : > { %s3450_s26 = smov 90   ;;  %s3460_s17 = smov 126   ;;  %vm3459_vm9 = vcmask 883712   ;;  %vm3458_vm10 = vcmask 891904   ;;  %vm3457_vm11 = vcmask 900096   ;;  %vm3454_vm12 = vcmask 736256  }
  0x37   : > { %s3447_s19 = smov 127   ;;  %v2213_v54 = vld [vmem:[%s3427_s2 + $0x4] sm:$0xf]  ;;  %v2096_v55 = vld [vmem:[%s3427_s2 + $0x8] sm:$0xf0]  ;;  %vm3449_vm13 = vcmask 130048  }
  0x38   : > { %v2099_v60 = vor.u32 %v2213_v54, %v2096_v55  ;;  %vm3456_vm14 = vcmask 1031168   ;;  %v451_v5 = vld [vmem:[%s3428_s3] sm:$0xff]  ;;  %vm3455_vm15 = vcmask 1039360   ;;  %s3491_s16 = smov 127   ;;  %s3532_s20 = smov 91  }
  0x39   : > { %s3533_s30 = smov 108  }
  0x3c   : > { %465 = vrot.lane.b32.xlu0 %v455_v9, %s2422_s21 }
  0x3d   : > { %467 = vrot.lane.b32.xlu1 %v456_v10, %s2422_s21 }
  0xa6   : > { %v462_v11 = vpop.permute.xlu0 %461 }
  0xa7   : > { %v464_v12 = vpop.permute.xlu1 %463  ;;  %v469_v14 = vrot.slane %v462_v11, 4 }
  0xa9   : > { %v472_v15 = vsel %vm471_vm4, %v469_v14, %v462_v11  ;;  %v473_v16 = vsel %vm471_vm4, %v469_v14, %v464_v12  ;;  %v452_v14 = vld [vmem:[%s3428_s3 + $0x8] sm:$0xff] }
  0xaa   : > { %483 = vst.msk [vmem:[#allocation2] sm:$0xff] %vm2623_vm5, %v472_v15 }
  0xab   : > { %485 = vst.msk [vmem:[#allocation2 + $0x8] sm:$0xf] %vm484_vm6, %v473_v16 }
  0xae   : > { %v466_v17 = vpop.permute.xlu0 %465 }
  0xaf   : > { %v468_v18 = vpop.permute.xlu1 %467  ;;  %v470_v19 = vrot.slane %v466_v17, 4 }
  0xb1   : > { %v474_v20 = vsel %vm471_vm4, %v470_v19, %v466_v17  ;;  %v475_v21 = vsel %vm471_vm4, %v470_v19, %v468_v18  ;;  %v2215_v22 = vld [vmem:[#allocation2 + $0x4] sm:$0xf]  ;;  %v2082_v29 = vld [vmem:[#allocation2] sm:$0xf]  ;;  %v2214_v19 = vld [vmem:[%s3427_s2 + $0x4] sm:$0xf0] }
  0xb2   : > { %486 = vst.msk [vmem:[#allocation2 + $0xc] sm:$0xff] %vm2623_vm5, %v474_v20  ;;  %v2090_v24 = vld [vmem:[#allocation2 + $0x8] sm:$0xf]  ;;  %v2094_v18 = vld [vmem:[%s3427_s2] sm:$0xf] }
  0xb3   : > { %487 = vst.msk [vmem:[#allocation2 + $0x14] sm:$0xf] %vm484_vm6, %v475_v21  ;;  %v2095_v20 = vor.u32 %v2214_v19, %v2094_v18 }
  0xb9   : > { %v2084_v23 = vld [vmem:[#allocation2 + $0xc] sm:$0xf0]  ;;  %v2216_v28 = vld [vmem:[#allocation2 + $0x8] sm:$0xf0] }
  0xba   : > { %v2217_v25 = vld [vmem:[#allocation2 + $0x10] sm:$0xf0]  ;;  %v2637_v26 = vor.u32 %v2215_v22, %v2084_v23  ;;  %v2653_v30 = vor.u32 %v2216_v28, %v2082_v29  ;;  %v441_v23 = vld [vmem:[%s3425_s0] sm:$0x7] }
  0xbb   : > { %v2639_v27 = vor.u32 %v2217_v25, %v2090_v24  ;;  %vm442_vm0 = vcmp.gt.f32.partialorder %v441_v23, 0.5 }
  0xbc   : > { %570 = vrot.lane.b32.xlu0 %v2637_v26, %s3470_s27  ;;  %582 = vrot.lane.b32.xlu2 %v2637_v26, %s3468_s13 }
  0xbd   : > { %572 = vrot.lane.b32.xlu1 %v2639_v27, %s3470_s27 }
  0xc4   : > { %558 = vrot.lane.b32.xlu0 %v2637_v26, %s3466_s15  ;;  %584 = vrot.lane.b32.xlu2 %v2639_v27, %s3468_s13 }
  0xc5   : > { %560 = vrot.lane.b32.xlu1 %v2639_v27, %s3466_s15 }
  0xcc   : > { %546 = vrot.lane.b32.xlu0 %v2637_v26, %s3464_s28  ;;  %580 = vrot.lane.b32.xlu2 %v2653_v30, %s3468_s13 }
  0xcd   : > { %548 = vrot.lane.b32.xlu1 %v2639_v27, %s3464_s28 }
  0xd4   : > { %534 = vrot.lane.b32.xlu0 %v2637_v26, %s3462_s29  ;;  %568 = vrot.lane.b32.xlu2 %v2653_v30, %s3470_s27 }
  0xd5   : > { %536 = vrot.lane.b32.xlu1 %v2639_v27, %s3462_s29 }
  0xdc   : > { %596 = vrot.lane.b32.xlu0 %v2639_v27, %s3450_s26  ;;  %556 = vrot.lane.b32.xlu2 %v2653_v30, %s3466_s15 }
  0xdd   : > { %544 = vrot.lane.b32.xlu1 %v2653_v30, %s3464_s28 }
  0xe4   : > { %524 = vrot.lane.b32.xlu0 %v2639_v27, %s3460_s17  ;;  %594 = vrot.lane.b32.xlu2 %v2637_v26, %s3450_s26 }
  0xe5   : > { %592 = vrot.lane.b32.xlu1 %v2653_v30, %s3450_s26 }
  0xec   : > { %510 = vrot.lane.b32.xlu0 %v2637_v26, %s3447_s19  ;;  %522 = vrot.lane.b32.xlu2 %v2637_v26, %s3460_s17 }
  0xed   : > { %512 = vrot.lane.b32.xlu1 %v2639_v27, %s3447_s19 }
  0xf4   : > { %508 = vrot.lane.b32.xlu0 %v2653_v30, %s3447_s19  ;;  %532 = vrot.lane.b32.xlu2 %v2653_v30, %s3462_s29 }
  0xf5   : > { %606 = vperm.xlu1 %2302, %v451_v5  }
  0xfc   : > { %520 = vrot.lane.b32.xlu2 %v2653_v30, %s3460_s17 }
 0x104   : > { %611 = vperm.xlu2 %2303, %v452_v14  }
 0x116   : > { %v583_v31 = vpop.permute.xlu2 %582 }
 0x11e   : > { %v585_v32 = vpop.permute.xlu2 %584 }
 0x11f   : > { %v588_v33 = vsel %vm586_vm7, %v583_v31, %v585_v32 }
 0x120   : > { %655 = vmatpush.bf16.msra.mxu2 %v588_v33 }
 0x126   : > { %v581_v34 = vpop.permute.xlu2 %580 }
 0x127   : > { %v587_v35 = vsel %vm586_vm7, %v581_v34, %v583_v31 }
 0x128   : > { %627 = vmatpush.bf16.msra.mxu0 %v587_v35 }
 0x12e   : > { %v571_v36 = vpop.permute.xlu0 %570  ;;  %v569_v37 = vpop.permute.xlu2 %568 }
 0x12f   : > { %v573_v38 = vpop.permute.xlu1 %572  ;;  %v575_v39 = vsel %vm574_vm8, %v569_v37, %v571_v36 }
 0x130   : > { %628 = vmatpush.bf16.msra.mxu0 %v575_v39  ;;  %v576_v40 = vsel %vm574_vm8, %v571_v36, %v573_v38 }
 0x131   : > { %656 = vmatpush.bf16.msra.mxu2 %v576_v40 }
 0x136   : > { %v559_v41 = vpop.permute.xlu0 %558  ;;  %v557_v42 = vpop.permute.xlu2 %556 }
 0x137   : > { %v561_v43 = vpop.permute.xlu1 %560  ;;  %v563_v44 = vsel %vm3459_vm9, %v557_v42, %v559_v41 }
 0x138   : > { %629 = vmatpush.bf16.msra.mxu0 %v563_v44  ;;  %v564_v45 = vsel %vm3459_vm9, %v559_v41, %v561_v43 }
 0x139   : > { %657 = vmatpush.bf16.msra.mxu2 %v564_v45 }
 0x13e   : > { %v547_v46 = vpop.permute.xlu0 %546  ;;  %v595_v47 = vpop.permute.xlu2 %594 }
 0x13f   : > { %v549_v48 = vpop.permute.xlu1 %548 }
 0x140   : > { %v552_v49 = vsel %vm3458_vm10, %v547_v46, %v549_v48 }
 0x141   : > { %658 = vmatpush.bf16.msra.mxu2 %v552_v49 }
 0x146   : > { %v535_v50 = vpop.permute.xlu0 %534  ;;  %v523_v51 = vpop.permute.xlu2 %522 }
 0x147   : > { %v537_v52 = vpop.permute.xlu1 %536 }
 0x148   : > { %v540_v53 = vsel %vm3457_vm11, %v535_v50, %v537_v52 }
 0x149   : > { %659 = vmatpush.bf16.msra.mxu2 %v540_v53 }
 0x14e   : > { %v597_v56 = vpop.permute.xlu0 %596  ;;  %v533_v57 = vpop.permute.xlu2 %532 }
 0x14f   : > { %v545_v58 = vpop.permute.xlu1 %544  ;;  %v600_v59 = vsel %vm3454_vm12, %v595_v47, %v597_v56  ;;  %v539_v62 = vsel %vm3457_vm11, %v533_v57, %v535_v50 }
 0x150   : > { %v551_v61 = vsel %vm3458_vm10, %v545_v58, %v547_v46  ;;  %676 = vmatpush.bf16.msra.mxu3 %v600_v59 }
 0x151   : > { %630 = vmatpush.bf16.msra.mxu0 %v551_v61 }
 0x153   : > { %2101 = vmatmul.msk.bf16.vlgmr.msra.gmra.mxu3 %vm3449_vm13, %v2099_v60 }
 0x154   : > { %704 = vmatpush.bf16.msrb.mxu3 %v597_v56 }
 0x155   : > { %631 = vmatpush.bf16.msra.mxu0 %v539_v62 }
 0x156   : > { %v525_v63 = vpop.permute.xlu0 %524  ;;  %v521_v4 = vpop.permute.xlu2 %520 }
 0x157   : > { %v593_v9 = vpop.permute.xlu1 %592  ;;  %v527_v10 = vsel %vm3456_vm14, %v521_v4, %v523_v51  ;;  %v528_v11 = vsel %vm3456_vm14, %v523_v51, %v525_v63 }
 0x158   : > { %v599_v12 = vsel %vm3454_vm12, %v593_v9, %v595_v47  ;;  %660 = vmatpush.bf16.msra.mxu2 %v528_v11 }
 0x159   : > { %632 = vmatpush.bf16.msra.mxu0 %v527_v10  ;;  %648 = vmatpush.bf16.msra.mxu1 %v599_v12 }
 0x15c   : > { %2100 = vmatmul.msk.bf16.vlgmr.msra.gmra.mxu1 %vm3449_vm13, %v2099_v60 }
 0x15d   : > { %683 = vmatpush.bf16.msrb.mxu1 %v585_v32 }
 0x15e   : > { %v511_v15 = vpop.permute.xlu0 %510  ;;  %v612_v41 = vpop.permute.xlu2 %611 }
 0x15f   : > { %v513_v16 = vpop.permute.xlu1 %512 }
 0x160   : > { %v516_v17 = vsel %vm3455_vm15, %v511_v15, %v513_v16 }
 0x161   : > { %684 = vmatpush.bf16.msrb.mxu1 %v573_v38  ;;  %661 = vmatpush.bf16.msra.mxu2 %v516_v17  ;;  %v1972_v38 = vld [vmem:[%s2580_s14 + $0x20] sm:$0xff] }
 0x163   : > { %2102 = vmatmul.msk.bf16.vlgmr.msrb.gmra.mxu3 %vm3449_vm13, %v2099_v60 }
 0x165   : > { %685 = vmatpush.bf16.msrb.mxu1 %v561_v43  ;;  %662 = vmatpush.bf16.msra.mxu2 %v2637_v26  ;;  %v711_v26 = vsel %vm442_vm0, 1, %v2421_v0  ;;  %vm3453_vm0 = vcmask 556032  }
 0x166   : > { %v509_v21 = vpop.permute.xlu0 %508  ;;  %v713_v29 = vperm.slane %v711_v26, 1  ;;  %v712_v31 = vperm.slane %v711_v26, 0  ;;  %v714_v47 = vperm.slane %v711_v26, 2 }
 0x167   : > { %v515_v22 = vsel %vm3455_vm15, %v509_v21, %v511_v15  ;;  %v607_v28 = vpop.permute.xlu1 %606 }
 0x168   : > { %663 = vmatmul.bf16.vlgmr.msra.gmra.mxu2 %v2095_v20  ;;  %633 = vmatpush.bf16.msra.mxu0 %v515_v22  ;;  %vm2735_vm1 = vcmp.eq.s32.totalorder %v713_v29, 1  ;;  %vm2739_vm2 = vcmp.eq.s32.totalorder %v712_v31, 1  ;;  %vm2748_vm3 = vcmp.eq.s32.totalorder %v714_v47, 1 }
 0x169   : > { %686 = vmatpush.bf16.msrb.mxu1 %v549_v48 }
 0x16c   : > { %634 = vmatpush.bf16.msra.mxu0 %v2653_v30 }
 0x16d   : > { %687 = vmatpush.bf16.msrb.mxu1 %v537_v52 }
 0x16f   : > { %635 = vmatmul.bf16.vlgmr.msra.gmra.mxu0 %v2095_v20 }
 0x171   : > { %688 = vmatpush.bf16.msrb.mxu1 %v525_v63 }
 0x175   : > { %689 = vmatpush.bf16.msrb.mxu1 %v513_v16 }
 0x179   : > { %690 = vmatpush.bf16.msrb.mxu1 %v2639_v27 }
 0x17c   : > { %691 = vmatmul.bf16.vlgmr.msrb.gmra.mxu1 %v2095_v20 }
 0x1d6   : > { %v678_v24 = vpop.f32.mrf.mxu3 }
 0x1d9   : > { %v650_v25 = vpop.f32.mrf.mxu1 }
 0x1de   : > { %v680_v30 = vpop.f32.mrf.mxu3 }
 0x1e1   : > { %v652_v36 = vpop.f32.mrf.mxu1 }
 0x1e6   : > { %v706_v50 = vpop.f32.mrf.mxu3 }
 0x1eb   : > { %v664_v32 = vpop.f32.mrf.mxu2 }
 0x1ec   : > { %v665_v33 = vadd.f32 %v664_v32, %v607_v28  ;;  %v636_v34 = vpop.f32.mrf.mxu0 }
 0x1ed   : > { %v637_v27 = vadd.f32 %v636_v34, %v607_v28 }
 0x1ee   : > { %v679_v37 = vadd.f32 %v678_v24, %v665_v33  ;;  %v708_v10 = vpop.f32.mrf.mxu3 }
 0x1ef   : > { %v651_v39 = vadd.f32 %v650_v25, %v637_v27 }
 0x1f0   : > { %v719_v0 = vsel %vm2735_vm1, %v679_v37, 0.0  ;;  %v733_v37 = vld [vmem:[%s3430_s5 + $0x8] sm:$0xff] }
 0x1f1   : > { %v718_v40 = vsel %vm2739_vm2, %v651_v39, 0.0  ;;  %v725_v42 = vmax.f32 %v719_v0, 0.0 }
 0x1f2   : > { %v724_v43 = vmax.f32 %v718_v40, 0.0 }
 0x1f3   : > { %v666_v44 = vpop.f32.mrf.mxu2 }
 0x1f4   : > { %v667_v45 = vadd.f32 %v666_v44, %v612_v41  ;;  %v638_v46 = vpop.f32.mrf.mxu0  ;;  %v734_v48 = vpack.c.bf16 %v725_v42, %v724_v43 }
 0x1f5   : > { %v639_v49 = vadd.f32 %v638_v46, %v612_v41 }
 0x1f6   : > { %v681_v51 = vadd.f32 %v680_v30, %v667_v45  ;;  %742 = vrot.lane.b32.xlu0 %v734_v48, %s2422_s21 }
 0x1f7   : > { %v653_v53 = vadd.f32 %v652_v36, %v639_v49  ;;  %v732_v36 = vld [vmem:[%s3430_s5] sm:$0xff] }
 0x1f8   : > { %v722_v56 = vsel %vm2735_vm1, %v681_v51, 0.0 }
 0x1f9   : > { %v692_v52 = vpop.f32.mrf.mxu1  ;;  %v721_v57 = vsel %vm2739_vm2, %v653_v53, 0.0  ;;  %v728_v60 = vmax.f32 %v722_v56, 0.0 }
 0x1fa   : > { %v693_v54 = vadd.f32 %v692_v52, %v607_v28  ;;  %v727_v59 = vmax.f32 %v721_v57, 0.0 }
 0x1fc   : > { %v707_v58 = vadd.f32 %v706_v50, %v693_v54  ;;  %v736_v62 = vpack.c.bf16 %v728_v60, %v727_v59 }
 0x1fe   : > { %v720_v61 = vsel %vm2748_vm3, %v707_v58, 0.0  ;;  %746 = vrot.lane.b32.xlu1 %v736_v62, %s2422_s21 }
 0x1ff   : > { %v726_v63 = vmax.f32 %v720_v61, 0.0 }
 0x201   : > { %v694_v4 = vpop.f32.mrf.mxu1  ;;  %v735_v5 = vpack.c.bf16 %v726_v63, %v726_v63  ;;  %v2218_v63 = vld [vmem:[%s3429_s4 + $0x4] sm:$0xf] }
 0x202   : > { %v695_v9 = vadd.f32 %v694_v4, %v612_v41  ;;  %v2119_v4 = vld [vmem:[%s3429_s4 + $0x8] sm:$0xf0] }
 0x203   : > { %744 = vrot.lane.b32.xlu2 %v735_v5, %s2422_s21 }
 0x204   : > { %v709_v11 = vadd.f32 %v708_v10, %v695_v9 }
 0x206   : > { %v723_v12 = vsel %vm2748_vm3, %v709_v11, 0.0 }
 0x207   : > { %v729_v14 = vmax.f32 %v723_v12, 0.0  ;;  %v2122_v12 = vor.u32 %v2218_v63, %v2119_v4 }
 0x209   : > { %v737_v15 = vpack.c.bf16 %v729_v14, %v729_v14 }
 0x20b   : > { %748 = vrot.lane.b32.xlu0 %v737_v15, %s2422_s21 }
 0x25d   : > { %v745_v18 = vpop.permute.xlu2 %744 }
 0x268   : > { %v743_v16 = vpop.permute.xlu0 %742 }
 0x269   : > { %v750_v17 = vrot.slane %v743_v16, 4 }
 0x26b   : > { %v752_v19 = vsel %vm471_vm4, %v750_v17, %v743_v16  ;;  %v753_v20 = vsel %vm471_vm4, %v750_v17, %v745_v18 }
 0x26c   : > { %760 = vst.msk [vmem:[#allocation2] sm:$0xff] %vm2623_vm5, %v752_v19 }
 0x26d   : > { %761 = vst.msk [vmem:[#allocation2 + $0x8] sm:$0xf] %vm484_vm6, %v753_v20 }
 0x270   : > { %v747_v21 = vpop.permute.xlu1 %746 }
 0x271   : > { %v751_v22 = vrot.slane %v747_v21, 4 }
 0x273   : > { %v754_v23 = vsel %vm471_vm4, %v751_v22, %v747_v21  ;;  %v2220_v24 = vld [vmem:[#allocation2 + $0x4] sm:$0xf]  ;;  %v2105_v29 = vld [vmem:[#allocation2] sm:$0xf] }
 0x274   : > { %762 = vst.msk [vmem:[#allocation2 + $0xc] sm:$0xff] %vm2623_vm5, %v754_v23  ;;  %v2113_v34 = vld [vmem:[#allocation2 + $0x8] sm:$0xf] }
 0x27b   : > { %v2107_v26 = vld [vmem:[#allocation2 + $0xc] sm:$0xf0]  ;;  %v2221_v31 = vld [vmem:[#allocation2 + $0x8] sm:$0xf0] }
 0x27c   : > { %v2773_v32 = vor.u32 %v2221_v31, %v2105_v29  ;;  %v2775_v30 = vor.u32 %v2220_v24, %v2107_v26  ;;  %v2117_v24 = vld [vmem:[%s3429_s4] sm:$0xf] }
 0x27d   : > { %v749_v25 = vpop.permute.xlu0 %748 }
 0x27e   : > { %v755_v28 = vsel %vm471_vm4, %v751_v22, %v749_v25  ;;  %850 = vrot.lane.b32.xlu1 %v2773_v32, %s3468_s13  ;;  %852 = vrot.lane.b32.xlu2 %v2775_v30, %s3468_s13  ;;  %v2219_v25 = vld [vmem:[%s3429_s4 + $0x4] sm:$0xf0] }
 0x27f   : > { %763 = vst.msk [vmem:[#allocation2 + $0x14] sm:$0xf] %vm484_vm6, %v755_v28  ;;  %v2118_v26 = vor.u32 %v2219_v25, %v2117_v24 }
 0x286   : > { %v2222_v33 = vld [vmem:[#allocation2 + $0x10] sm:$0xf0]  ;;  %839 = vrot.lane.b32.xlu1 %v2773_v32, %s3470_s27  ;;  %841 = vrot.lane.b32.xlu2 %v2775_v30, %s3470_s27 }
 0x287   : > { %v2781_v27 = vor.u32 %v2222_v33, %v2113_v34 }
 0x289   : > { %854 = vrot.lane.b32.xlu0 %v2781_v27, %s3468_s13 }
 0x28e   : > { %828 = vrot.lane.b32.xlu1 %v2773_v32, %s3466_s15  ;;  %830 = vrot.lane.b32.xlu2 %v2775_v30, %s3466_s15 }
 0x291   : > { %843 = vrot.lane.b32.xlu0 %v2781_v27, %s3470_s27 }
 0x296   : > { %817 = vrot.lane.b32.xlu1 %v2773_v32, %s3464_s28  ;;  %819 = vrot.lane.b32.xlu2 %v2775_v30, %s3464_s28 }
 0x299   : > { %832 = vrot.lane.b32.xlu0 %v2781_v27, %s3466_s15 }
 0x29e   : > { %806 = vrot.lane.b32.xlu1 %v2773_v32, %s3462_s29  ;;  %808 = vrot.lane.b32.xlu2 %v2775_v30, %s3462_s29 }
 0x2a1   : > { %821 = vrot.lane.b32.xlu0 %v2781_v27, %s3464_s28 }
 0x2a6   : > { %861 = vrot.lane.b32.xlu1 %v2773_v32, %s3450_s26  ;;  %863 = vrot.lane.b32.xlu2 %v2775_v30, %s3450_s26 }
 0x2a9   : > { %810 = vrot.lane.b32.xlu0 %v2781_v27, %s3462_s29 }
 0x2ae   : > { %797 = vrot.lane.b32.xlu1 %v2775_v30, %s3460_s17  ;;  %799 = vrot.lane.b32.xlu2 %v2781_v27, %s3460_s17 }
 0x2b1   : > { %795 = vrot.lane.b32.xlu0 %v2773_v32, %s3460_s17 }
 0x2b6   : > { %784 = vrot.lane.b32.xlu1 %v2773_v32, %s3491_s16  ;;  %786 = vrot.lane.b32.xlu2 %v2775_v30, %s3491_s16 }
 0x2b9   : > { %865 = vrot.lane.b32.xlu0 %v2781_v27, %s3450_s26  ;;  %s3492_s26 = smov 90  }
 0x2be   : > { %874 = vperm.xlu1 %2302, %v732_v36   ;;  %879 = vperm.xlu2 %2303, %v733_v37  }
 0x2c1   : > { %788 = vrot.lane.b32.xlu0 %v2781_v27, %s3491_s16 }
 0x2d8   : > { %v853_v39 = vpop.permute.xlu2 %852 }
 0x2e0   : > { %v842_v0 = vpop.permute.xlu2 %841 }
 0x2e8   : > { %v831_v42 = vpop.permute.xlu2 %830 }
 0x2f0   : > { %v851_v40 = vpop.permute.xlu1 %850  ;;  %v820_v47 = vpop.permute.xlu2 %819 }
 0x2f1   : > { %v856_v41 = vsel %vm586_vm7, %v851_v40, %v853_v39 }
 0x2f2   : > { %894 = vmatpush.bf16.msra.mxu3 %v856_v41 }
 0x2f8   : > { %v840_v44 = vpop.permute.xlu1 %839  ;;  %v809_v54 = vpop.permute.xlu2 %808 }
 0x2f9   : > { %v845_v46 = vsel %vm574_vm8, %v840_v44, %v842_v0 }
 0x2fa   : > { %895 = vmatpush.bf16.msra.mxu3 %v845_v46 }
 0x2fb   : > { %v855_v43 = vpop.permute.xlu0 %854 }
 0x2fc   : > { %v857_v45 = vsel %vm586_vm7, %v853_v39, %v855_v43 }
 0x2fd   : > { %922 = vmatpush.bf16.msrb.mxu2 %v857_v45 }
 0x300   : > { %v829_v49 = vpop.permute.xlu1 %828  ;;  %v864_v62 = vpop.permute.xlu2 %863 }
 0x301   : > { %v834_v51 = vsel %vm3459_vm9, %v829_v49, %v831_v42 }
 0x302   : > { %896 = vmatpush.bf16.msra.mxu3 %v834_v51 }
 0x303   : > { %v844_v48 = vpop.permute.xlu0 %843 }
 0x304   : > { %v846_v50 = vsel %vm574_vm8, %v842_v0, %v844_v48 }
 0x305   : > { %923 = vmatpush.bf16.msrb.mxu2 %v846_v50 }
 0x308   : > { %v818_v53 = vpop.permute.xlu1 %817  ;;  %v800_v14 = vpop.permute.xlu2 %799 }
 0x309   : > { %v823_v57 = vsel %vm3458_vm10, %v818_v53, %v820_v47 }
 0x30a   : > { %897 = vmatpush.bf16.msra.mxu3 %v823_v57 }
 0x30b   : > { %v833_v52 = vpop.permute.xlu0 %832 }
 0x30c   : > { %v835_v56 = vsel %vm3459_vm9, %v831_v42, %v833_v52 }
 0x30d   : > { %924 = vmatpush.bf16.msrb.mxu2 %v835_v56 }
 0x310   : > { %v807_v59 = vpop.permute.xlu1 %806  ;;  %v787_v19 = vpop.permute.xlu2 %786 }
 0x311   : > { %v812_v61 = vsel %vm3457_vm11, %v807_v59, %v809_v54 }
 0x312   : > { %898 = vmatpush.bf16.msra.mxu3 %v812_v61 }
 0x313   : > { %v822_v58 = vpop.permute.xlu0 %821 }
 0x314   : > { %v824_v60 = vsel %vm3458_vm10, %v820_v47, %v822_v58 }
 0x315   : > { %925 = vmatpush.bf16.msrb.mxu2 %v824_v60 }
 0x318   : > { %v862_v9 = vpop.permute.xlu1 %861 }
 0x319   : > { %v867_v11 = vsel %vm3454_vm12, %v862_v9, %v864_v62 }
 0x31a   : > { %915 = vmatpush.bf16.msrb.mxu0 %v867_v11 }
 0x31b   : > { %v811_v5 = vpop.permute.xlu0 %810 }
 0x31c   : > { %v813_v10 = vsel %vm3457_vm11, %v809_v54, %v811_v5 }
 0x31d   : > { %926 = vmatpush.bf16.msrb.mxu2 %v813_v10  ;;  %2123 = vmatmul.msk.bf16.vlgmr.msrb.gmra.mxu0 %vm3449_vm13, %v2122_v12 }
 0x31e   : > { %950 = vmatpush.bf16.msra.mxu0 %v855_v43 }
 0x320   : > { %v798_v16 = vpop.permute.xlu1 %797 }
 0x321   : > { %v802_v18 = vsel %vm3456_vm14, %v798_v16, %v800_v14 }
 0x322   : > { %951 = vmatpush.bf16.msra.mxu0 %v844_v48  ;;  %927 = vmatpush.bf16.msrb.mxu2 %v802_v18 }
 0x323   : > { %v796_v15 = vpop.permute.xlu0 %795 }
 0x324   : > { %v801_v17 = vsel %vm3456_vm14, %v796_v15, %v798_v16  ;;  %v997_v15 = vld [vmem:[%s3431_s6] sm:$0xff]  ;;  %v998_v16 = vld [vmem:[%s3431_s6 + $0x8] sm:$0xff] }
 0x325   : > { %899 = vmatpush.bf16.msra.mxu3 %v801_v17 }
 0x326   : > { %952 = vmatpush.bf16.msra.mxu0 %v833_v52 }
 0x328   : > { %v785_v21 = vpop.permute.xlu1 %784 }
 0x329   : > { %v790_v23 = vsel %vm3455_vm15, %v785_v21, %v787_v19 }
 0x32a   : > { %953 = vmatpush.bf16.msra.mxu0 %v822_v58  ;;  %900 = vmatpush.bf16.msra.mxu3 %v790_v23 }
 0x32b   : > { %v866_v20 = vpop.permute.xlu0 %865 }
 0x32c   : > { %v868_v22 = vsel %vm3454_vm12, %v864_v62, %v866_v20 }
 0x32d   : > { %943 = vmatpush.bf16.msra.mxu1 %v868_v22 }
 0x32e   : > { %954 = vmatpush.bf16.msra.mxu0 %v811_v5  ;;  %901 = vmatpush.bf16.msra.mxu3 %v2773_v32 }
 0x330   : > { %2124 = vmatmul.msk.bf16.vlgmr.msra.gmra.mxu1 %vm3449_vm13, %v2122_v12  ;;  %v875_v37 = vpop.permute.xlu1 %874 }
 0x331   : > { %971 = vmatpush.bf16.msrb.mxu1 %v866_v20  ;;  %902 = vmatmul.bf16.vlgmr.msra.gmra.mxu3 %v2118_v26 }
 0x332   : > { %955 = vmatpush.bf16.msra.mxu0 %v800_v14 }
 0x333   : > { %v789_v28 = vpop.permute.xlu0 %788 }
 0x334   : > { %v791_v29 = vsel %vm3455_vm15, %v787_v19, %v789_v28 }
 0x335   : > { %928 = vmatpush.bf16.msrb.mxu2 %v791_v29 }
 0x336   : > { %956 = vmatpush.bf16.msra.mxu0 %v789_v28 }
 0x339   : > { %929 = vmatpush.bf16.msrb.mxu2 %v2775_v30 }
 0x33a   : > { %957 = vmatpush.bf16.msra.mxu0 %v2781_v27  ;;  %v880_v27 = vpop.permute.xlu2 %879 }
 0x33c   : > { %930 = vmatmul.bf16.vlgmr.msrb.gmra.mxu2 %v2118_v26 }
 0x33d   : > { %958 = vmatmul.bf16.vlgmr.msra.gmra.mxu0 %v2118_v26 }
 0x340   : > { %2125 = vmatmul.msk.bf16.vlgmr.msrb.gmra.mxu1 %vm3449_vm13, %v2122_v12  ;;  %vm3452_vm13 = vcmask 31744  }
 0x39a   : > { %v917_v31 = vpop.f32.mrf.mxu0 }
 0x3a2   : > { %v919_v34 = vpop.f32.mrf.mxu0 }
 0x3ad   : > { %v945_v33 = vpop.f32.mrf.mxu1 }
 0x3b4   : > { %v903_v32 = vpop.f32.mrf.mxu3 }
 0x3b5   : > { %v947_v36 = vpop.f32.mrf.mxu1  ;;  %v904_v40 = vadd.f32 %v903_v32, %v875_v37  ;;  %v1014_v32 = vld [vmem:[%s3433_s8] sm:$0xff] }
 0x3b7   : > { %v918_v44 = vadd.f32 %v917_v31, %v904_v40  ;;  %v1011_v31 = vld [vmem:[%s3432_s7] sm:$0x1]  ;;  %v1015_v40 = vld [vmem:[%s3433_s8 + $0x8] sm:$0xff] }
 0x3b9   : > { %v2873_v51 = vsel %vm2739_vm2, %v918_v44, 0.0 }
 0x3ba   : > { %v959_v39 = vpop.f32.mrf.mxu0 }
 0x3bb   : > { %v960_v0 = vadd.f32 %v959_v39, %v875_v37 }
 0x3bc   : > { %v905_v45 = vpop.f32.mrf.mxu3 }
 0x3bd   : > { %v973_v41 = vpop.f32.mrf.mxu1  ;;  %v906_v50 = vadd.f32 %v905_v45, %v880_v27 }
 0x3be   : > { %v974_v42 = vadd.f32 %v973_v41, %v960_v0 }
 0x3bf   : > { %v931_v43 = vpop.f32.mrf.mxu2  ;;  %v920_v60 = vadd.f32 %v919_v34, %v906_v50 }
 0x3c0   : > { %v932_v30 = vadd.f32 %v931_v43, %v875_v37  ;;  %v2869_v48 = vsel %vm2748_vm3, %v974_v42, 0.0  ;;  %v1025_v43 = vld [vmem:[%s3434_s9] sm:$0xff] }
 0x3c1   : > { %v986_v56 = vsel %vm3453_vm0, %v2869_v48, 0.0  ;;  %v2889_v4 = vsel %vm2739_vm2, %v920_v60, 0.0 }
 0x3c2   : > { %v946_v46 = vadd.f32 %v945_v33, %v932_v30  ;;  %v961_v47 = vpop.f32.mrf.mxu0 }
 0x3c3   : > { %v962_v49 = vadd.f32 %v961_v47, %v880_v27 }
 0x3c4   : > { %v2877_v52 = vsel %vm2735_vm1, %v946_v46, 0.0  ;;  %v1026_v46 = vld [vmem:[%s3434_s9 + $0x8] sm:$0xff] }
 0x3c5   : > { %v975_v53 = vpop.f32.mrf.mxu1  ;;  %v984_v54 = vadd.f32 %v2877_v52, %v2873_v51 }
 0x3c6   : > { %v976_v57 = vadd.f32 %v975_v53, %v962_v49 }
 0x3c7   : > { %v933_v58 = vpop.f32.mrf.mxu2  ;;  %v987_v59 = vadd.f32 %v986_v56, %v984_v54 }
 0x3c8   : > { %v934_v61 = vadd.f32 %v933_v58, %v880_v27  ;;  %v2885_v63 = vsel %vm2748_vm3, %v976_v57, 0.0 }
 0x3c9   : > { %988 = vadd.xlane.f32.xlu0 %v987_v59  ;;  %v991_v10 = vsel %vm3453_vm0, %v2885_v63, 0.0 }
 0x3ca   : > { %v948_v62 = vadd.f32 %v947_v36, %v934_v61 }
 0x3cc   : > { %v2893_v5 = vsel %vm2735_vm1, %v948_v62, 0.0 }
 0x3cd   : > { %v990_v9 = vadd.f32 %v2893_v5, %v2889_v4 }
 0x3cf   : > { %v992_v11 = vadd.f32 %v991_v10, %v990_v9 }
 0x3d1   : > { %993 = vadd.xlane.f32.xlu1 %v992_v11 }
 0x43c   : > { %v989_v12 = vpop.xlane.xlu0 %988 }
 0x43d   : > { %v995_v14 = vmul.f32 0.00390625, %v989_v12 }
 0x43f   : > { %v999_v18 = vmul.f32 %v997_v15, %v995_v14 }
 0x441   : > { %v1002_v21 = vsel %vm3452_vm13, %v999_v18, 0.0 }
 0x444   : > { %v994_v17 = vpop.xlane.xlu1 %993 }
 0x445   : > { %v996_v19 = vmul.f32 0.00390625, %v994_v17 }
 0x447   : > { %v1000_v20 = vmul.f32 %v998_v16, %v996_v19 }
 0x449   : > { %v1003_v22 = vsel %vm3452_vm13, %v1000_v20, 0.0 }
 0x44a   : > { %v1004_v23 = vadd.f32 %v1003_v22, %v1002_v21 }
 0x44c   : > { %v1005_v24 = vrot.slane %v1004_v23, 4 }
 0x44e   : > { %v1006_v25 = vadd.f32 %v1005_v24, %v1004_v23 }
 0x450   : > { %v1007_v26 = vrot.slane %v1006_v25, 2 }
 0x452   : > { %v1008_v28 = vadd.f32 %v1007_v26, %v1006_v25 }
 0x454   : > { %v1009_v29 = vrot.slane %v1008_v28, 1 }
 0x456   : > { %v1010_v33 = vadd.f32 %v1009_v29, %v1008_v28 }
 0x458   : > { %v1012_v34 = vadd.f32 %v1011_v31, %v1010_v33 }
 0x45a   : > { %v1013_v36 = vmax.f32 %v1012_v34, 0.0 }
 0x45c   : > { %v1016_v37 = vperm.slane %v1013_v36, 0 }
 0x45e   : > { %v1017_v39 = vmul.f32 %v1016_v37, %v1014_v32  ;;  %v1018_v41 = vmul.f32 %v1016_v37, %v1015_v40 }
 0x460   : > { %v1019_v0 = vsel %vm3452_vm13, %v1017_v39, 0.0  ;;  %v1022_v42 = vsel %vm3452_vm13, %v1018_v41, 0.0 }
 0x461   : > { %1020 = vadd.xlane.f32.xlu2 %v1019_v0 }
 0x469   : > { %1023 = vadd.xlane.f32.xlu2 %v1022_v42 }
 0x4d4   : > { %v1021_v44 = vpop.xlane.xlu2 %1020 }
 0x4d5   : > { %v1027_v30 = vadd.f32 %v1025_v43, %v1021_v44 }
 0x4d7   : > { %v1029_v45 = vsub.f32 0.0, %v1027_v30 }
 0x4d9   : > { %v1031_v27 = vmul.f32 1.442695, %v1029_v45 }
 0x4db   : > { %2305 = vpow2.f32 %v1031_v27 }
 0x4dc   : > { %v1024_v47 = vpop.xlane.xlu2 %1023 }
 0x4dd   : > { %v1028_v49 = vadd.f32 %v1026_v46, %v1024_v47 }
 0x4df   : > { %v1030_v50 = vsub.f32 0.0, %v1028_v49 }
 0x4e1   : > { %v2306_v53 = vpop.eup %2305  ;;  %v1033_v54 = vmul.f32 1.442695, %v1030_v50 }
 0x4e2   : > { %v1035_v56 = vadd.f32 1.0, %v2306_v53 }
 0x4e3   : > { %2307 = vpow2.f32 %v1033_v54 }
 0x4e4   : > { %2309 = vrcp.f32 %v1035_v56  ;;  %v1048_v62 = vand.u32 2147483648, %v1035_v56  ;;  %v1046_v10 = vand.u32 2147483647, %v1035_v56  ;;  %vm1042_vm0 = vweird.f32 %v1035_v56 }
 0x4e6   : > { %v1049_v14 = vor.u32 1.1754944e-38, %v1048_v62  ;;  %vm1047_vm15 = vcmp.eq.f32.partialorder %v1046_v10, 8.507059e+37 }
 0x4e9   : > { %v2308_v57 = vpop.eup %2307 }
 0x4ea   : > { %v2310_v58 = vpop.eup %2309  ;;  %v1036_v59 = vadd.f32 1.0, %v2308_v57  ;;  %v2129_v57 = vld [vmem:[%s3428_s3 + $0x18] sm:$0xff] }
 0x4eb   : > { %v1038_v60 = vmul.f32 %v2310_v58, %v1035_v56  ;;  %vm1043_vm13 = vweird.f32 %v2310_v58  ;;  %v2128_v56 = vld [vmem:[%s3428_s3 + $0x10] sm:$0xff] }
 0x4ec   : > { %2311 = vrcp.f32 %v1036_v59  ;;  %vm1044_vm12 = vmor %vm1042_vm0, %vm1043_vm13  ;;  %v1063_v19 = vand.u32 2147483648, %v1036_v59  ;;  %v1061_v21 = vand.u32 2147483647, %v1036_v59  ;;  %vm1057_vm11 = vweird.f32 %v1036_v59 }
 0x4ed   : > { %v1039_v61 = vsub.f32 1.0, %v1038_v60  ;;  %vm3497_vm13 = vcmask 900096  }
 0x4ee   : > { %v1064_v23 = vor.u32 1.1754944e-38, %v1063_v19  ;;  %vm1062_vm9 = vcmp.eq.f32.partialorder %v1061_v21, 8.507059e+37  ;;  %vm3500_vm0 = vmmov %vm3497_vm13 }
 0x4ef   : > { %v1040_v9 = vmul.f32 %v2310_v58, %v1039_v61 }
 0x4f1   : > { %v1041_v11 = vadd.f32 %v2310_v58, %v1040_v9 }
 0x4f2   : > { %v2312_v12 = vpop.eup %2311 }
 0x4f3   : > { %v1045_v15 = vsel %vm1044_vm12, %v2310_v58, %v1041_v11  ;;  %v1053_v16 = vmul.f32 %v2312_v12, %v1036_v59  ;;  %vm1058_vm14 = vweird.f32 %v2312_v12 }
 0x4f4   : > { %v1050_v17 = vsel %vm1047_vm15, %v1049_v14, %v1045_v15  ;;  %vm1059_vm10 = vmor %vm1057_vm11, %vm1058_vm14  ;;  %vm3495_vm11 = vcmask 891904   ;;  %vm3498_vm14 = vcmask 1031168   ;;  %vm3499_vm15 = vcmask 1039360  }
 0x4f5   : > { %1069 = vperm.xlu0 %2304, %v1050_v17   ;;  %v1054_v18 = vsub.f32 1.0, %v1053_v16  ;;  %vm3496_vm12 = vmmov %vm3495_vm11 }
 0x4f7   : > { %v1055_v20 = vmul.f32 %v2312_v12, %v1054_v18 }
 0x4f9   : > { %v1056_v22 = vadd.f32 %v2312_v12, %v1055_v20 }
 0x4fb   : > { %v1060_v24 = vsel %vm1059_vm10, %v2312_v12, %v1056_v22 }
 0x4fc   : > { %v1065_v25 = vsel %vm1062_vm9, %v1064_v23, %v1060_v24  ;;  %vm3493_vm9 = vcmask 883712  }
 0x4fd   : > { %1074 = vperm.xlu1 %2302, %v1065_v25   ;;  %vm3494_vm10 = vmmov %vm3493_vm9 }
 0x567   : > { %v1070_v26 = vpop.permute.xlu0 %1069 }
 0x568   : > { %v1077_v28 = vmul.f32 %v1070_v26, %v2873_v51  ;;  %v1078_v29 = vmul.f32 %v1070_v26, %v2877_v52  ;;  %v1079_v34 = vmul.f32 %v1070_v26, %v2869_v48 }
 0x56a   : > { %v2927_v31 = vadd.f32 %v1077_v28, %v2592_v1  ;;  %v2930_v33 = vadd.f32 %v1078_v29, %v2595_v2  ;;  %v2937_v37 = vadd.f32 %v1079_v34, %v2598_v3 }
 0x56c   : > { %v1095_v36 = vpack.c.bf16 %v2930_v33, %v2927_v31  ;;  %v1096_v39 = vpack.c.bf16 %v2937_v37, %v2937_v37 }
 0x56e   : > { %1103 = vrot.lane.b32.xlu2 %v1095_v36, %s2422_s21 }
 0x56f   : > { %v1075_v32 = vpop.permute.xlu1 %1074 }
 0x570   : > { %v1080_v51 = vmul.f32 %v1075_v32, %v2889_v4  ;;  %v1081_v52 = vmul.f32 %v1075_v32, %v2893_v5  ;;  %v1082_v48 = vmul.f32 %v1075_v32, %v2885_v63 }
 0x572   : > { %v2942_v1 = vadd.f32 %v1080_v51, %v2607_v6  ;;  %v2945_v2 = vadd.f32 %v1081_v52, %v2610_v7  ;;  %v2955_v3 = vadd.f32 %v1082_v48, %v2613_v8 }
 0x574   : > { %v1097_v0 = vpack.c.bf16 %v2945_v2, %v2942_v1  ;;  %v1098_v6 = vpack.c.bf16 %v2955_v3, %v2955_v3 }
 0x576   : > { %1105 = vrot.lane.b32.xlu2 %v1096_v39, %s2422_s21  ;;  %1107 = vrot.lane.b32.xlu1 %v1097_v0, %s2422_s21  ;;  %v2144_v39 = vld [vmem:[%s3427_s2 + $0x10] sm:$0xf]  ;;  %v2224_v0 = vld [vmem:[%s3427_s2 + $0x14] sm:$0xf0] }
 0x57e   : > { %1109 = vrot.lane.b32.xlu1 %v1098_v6, %s2422_s21  ;;  %v2145_v6 = vor.u32 %v2224_v0, %v2144_v39 }
 0x5c8   : > { %v1104_v7 = vpop.permute.xlu2 %1103 }
 0x5c9   : > { %v1111_v63 = vrot.slane %v1104_v7, 4 }
 0x5cb   : > { %v1113_v4 = vsel %vm471_vm4, %v1111_v63, %v1104_v7  ;;  %v2223_v7 = vld [vmem:[%s3427_s2 + $0x14] sm:$0xf] }
 0x5cc   : > { %1121 = vst.msk [vmem:[#allocation2] sm:$0xff] %vm2623_vm5, %v1113_v4 }
 0x5d0   : > { %v1106_v5 = vpop.permute.xlu2 %1105 }
 0x5d1   : > { %v1114_v40 = vsel %vm471_vm4, %v1111_v63, %v1106_v5  ;;  %v2146_v63 = vld [vmem:[%s3427_s2 + $0x18] sm:$0xf0] }
 0x5d2   : > { %1122 = vst.msk [vmem:[#allocation2 + $0x8] sm:$0xf] %vm484_vm6, %v1114_v40 }
 0x5d3   : > { %v2132_v30 = vld [vmem:[#allocation2] sm:$0xf]  ;;  %v2225_v27 = vld [vmem:[#allocation2 + $0x4] sm:$0xf] }
 0x5d9   : > { %v2140_v53 = vld [vmem:[#allocation2 + $0x8] sm:$0xf] }
 0x5e8   : > { %v1108_v41 = vpop.permute.xlu1 %1107 }
 0x5e9   : > { %v1112_v8 = vrot.slane %v1108_v41, 4 }
 0x5eb   : > { %v1115_v42 = vsel %vm471_vm4, %v1112_v8, %v1108_v41 }
 0x5ec   : > { %1123 = vst.msk [vmem:[#allocation2 + $0xc] sm:$0xff] %vm2623_vm5, %v1115_v42  ;;  %v2149_v42 = vor.u32 %v2223_v7, %v2146_v63 }
 0x5f0   : > { %v1110_v43 = vpop.permute.xlu1 %1109 }
 0x5f1   : > { %v1116_v44 = vsel %vm471_vm4, %v1112_v8, %v1110_v43 }
 0x5f2   : > { %1124 = vst.msk [vmem:[#allocation2 + $0x14] sm:$0xf] %vm484_vm6, %v1116_v44 }
 0x5f3   : > { %v2226_v45 = vld [vmem:[#allocation2 + $0x8] sm:$0xf0]  ;;  %v2134_v46 = vld [vmem:[#allocation2 + $0xc] sm:$0xf0] }
 0x5f4   : > { %v2970_v47 = vor.u32 %v2226_v45, %v2132_v30  ;;  %v2972_v49 = vor.u32 %v2225_v27, %v2134_v46 }
 0x5f6   : > { %1200 = vrot.lane.b32.xlu1 %v2970_v47, %s3470_s27  ;;  %1211 = vrot.lane.b32.xlu2 %v2970_v47, %s3468_s13 }
 0x5f7   : > { %1213 = vrot.lane.b32.xlu0 %v2972_v49, %s3468_s13 }
 0x5f9   : > { %v2227_v50 = vld [vmem:[#allocation2 + $0x10] sm:$0xf0] }
 0x5fa   : > { %v2986_v54 = vor.u32 %v2227_v50, %v2140_v53 }
 0x5fe   : > { %1191 = vrot.lane.b32.xlu1 %v2972_v49, %s3466_s15  ;;  %1202 = vrot.lane.b32.xlu2 %v2972_v49, %s3470_s27 }
 0x5ff   : > { %1189 = vrot.lane.b32.xlu0 %v2970_v47, %s3466_s15 }
 0x606   : > { %1180 = vrot.lane.b32.xlu1 %v2972_v49, %s3464_s28  ;;  %1215 = vrot.lane.b32.xlu2 %v2986_v54, %s3468_s13 }
 0x607   : > { %1178 = vrot.lane.b32.xlu0 %v2970_v47, %s3464_s28 }
 0x60e   : > { %1169 = vrot.lane.b32.xlu1 %v2972_v49, %s3462_s29  ;;  %1204 = vrot.lane.b32.xlu2 %v2986_v54, %s3470_s27 }
 0x60f   : > { %1167 = vrot.lane.b32.xlu0 %v2970_v47, %s3462_s29 }
 0x616   : > { %1158 = vrot.lane.b32.xlu1 %v2972_v49, %s3460_s17  ;;  %1193 = vrot.lane.b32.xlu2 %v2986_v54, %s3466_s15 }
 0x617   : > { %1156 = vrot.lane.b32.xlu0 %v2970_v47, %s3460_s17 }
 0x61e   : > { %1147 = vrot.lane.b32.xlu1 %v2972_v49, %s3491_s16  ;;  %1182 = vrot.lane.b32.xlu2 %v2986_v54, %s3464_s28  ;;  %s3508_s28 = smov 109  }
 0x61f   : > { %1145 = vrot.lane.b32.xlu0 %v2970_v47, %s3491_s16 }
 0x626   : > { %1171 = vrot.lane.b32.xlu1 %v2986_v54, %s3462_s29  ;;  %1222 = vrot.lane.b32.xlu2 %v2970_v47, %s3492_s26  ;;  %s3509_s29 = smov 110  }
 0x627   : > { %1224 = vrot.lane.b32.xlu0 %v2972_v49, %s3492_s26 }
 0x62e   : > { %1226 = vrot.lane.b32.xlu1 %v2986_v54, %s3492_s26  ;;  %1160 = vrot.lane.b32.xlu2 %v2986_v54, %s3460_s17  ;;  %s3510_s17 = smov 126  }
 0x62f   : > { %1149 = vrot.lane.b32.xlu0 %v2986_v54, %s3491_s16 }
 0x636   : > { %1235 = vperm.xlu2 %2303, %v2128_v56  }
 0x637   : > { %1240 = vperm.xlu0 %2304, %v2129_v57  }
 0x650   : > { %v1212_v58 = vpop.permute.xlu2 %1211 }
 0x658   : > { %v1203_v59 = vpop.permute.xlu2 %1202 }
 0x660   : > { %v1216_v60 = vpop.permute.xlu2 %1215 }
 0x668   : > { %v1201_v61 = vpop.permute.xlu1 %1200  ;;  %v1205_v62 = vpop.permute.xlu2 %1204 }
 0x669   : > { %v1214_v9 = vpop.permute.xlu0 %1213  ;;  %v1206_v12 = vsel %vm574_vm8, %v1201_v61, %v1203_v59  ;;  %v1207_v14 = vsel %vm574_vm8, %v1203_v59, %v1205_v62 }
 0x66a   : > { %v1217_v10 = vsel %vm586_vm7, %v1212_v58, %v1214_v9  ;;  %v1218_v11 = vsel %vm586_vm7, %v1214_v9, %v1216_v60 }
 0x66b   : > { %1255 = vmatpush.bf16.msrb.mxu3 %v1217_v10  ;;  %1283 = vmatpush.bf16.msra.mxu1 %v1218_v11 }
 0x66f   : > { %1256 = vmatpush.bf16.msrb.mxu3 %v1206_v12  ;;  %1284 = vmatpush.bf16.msra.mxu1 %v1207_v14 }
 0x670   : > { %v1192_v15 = vpop.permute.xlu1 %1191  ;;  %v1194_v16 = vpop.permute.xlu2 %1193 }
 0x671   : > { %v1190_v17 = vpop.permute.xlu0 %1189  ;;  %v1196_v18 = vsel %vm3493_vm9, %v1192_v15, %v1194_v16  ;;  %vm3501_vm9 = vcmask 736256  }
 0x672   : > { %v1195_v19 = vsel %vm3494_vm10, %v1190_v17, %v1192_v15  ;;  %vm3502_vm10 = vmmov %vm3498_vm14 }
 0x673   : > { %1257 = vmatpush.bf16.msrb.mxu3 %v1195_v19  ;;  %1285 = vmatpush.bf16.msra.mxu1 %v1196_v18 }
 0x678   : > { %v1181_v20 = vpop.permute.xlu1 %1180  ;;  %v1183_v21 = vpop.permute.xlu2 %1182 }
 0x679   : > { %v1179_v22 = vpop.permute.xlu0 %1178  ;;  %v1185_v23 = vsel %vm3495_vm11, %v1181_v20, %v1183_v21  ;;  %vm3503_vm11 = vcmask 130048  }
 0x67a   : > { %v1184_v24 = vsel %vm3496_vm12, %v1179_v22, %v1181_v20  ;;  %1286 = vmatpush.bf16.msra.mxu1 %v1185_v23  ;;  %vm3504_vm12 = vmmov %vm3501_vm9 }
 0x67b   : > { %1258 = vmatpush.bf16.msrb.mxu3 %v1184_v24 }
 0x680   : > { %v1170_v25 = vpop.permute.xlu1 %1169  ;;  %v1223_v32 = vpop.permute.xlu2 %1222 }
 0x681   : > { %v1168_v26 = vpop.permute.xlu0 %1167 }
 0x682   : > { %v1173_v28 = vsel %vm3497_vm13, %v1168_v26, %v1170_v25  ;;  %vm3505_vm13 = vmmov %vm3499_vm15 }
 0x683   : > { %1259 = vmatpush.bf16.msrb.mxu3 %v1173_v28 }
 0x688   : > { %v1159_v29 = vpop.permute.xlu1 %1158  ;;  %v1161_v41 = vpop.permute.xlu2 %1160 }
 0x689   : > { %v1157_v34 = vpop.permute.xlu0 %1156  ;;  %v1163_v43 = vsel %vm3502_vm10, %v1159_v29, %v1161_v41  ;;  %vm3513_vm10 = vcmask 900096  }
 0x68a   : > { %v1162_v36 = vsel %vm3498_vm14, %v1157_v34, %v1159_v29  ;;  %vm3506_vm14 = vmmov %vm3503_vm11 }
 0x68b   : > { %1260 = vmatpush.bf16.msrb.mxu3 %v1162_v36 }
 0x690   : > { %v1148_v51 = vpop.permute.xlu1 %1147  ;;  %v1236_v50 = vpop.permute.xlu2 %1235 }
 0x691   : > { %v1146_v52 = vpop.permute.xlu0 %1145 }
 0x692   : > { %v1151_v48 = vsel %vm3499_vm15, %v1146_v52, %v1148_v51  ;;  %vm3507_vm15 = vmmov %vm3503_vm11 }
 0x693   : > { %1261 = vmatpush.bf16.msrb.mxu3 %v1151_v48 }
 0x697   : > { %1262 = vmatpush.bf16.msrb.mxu3 %v2970_v47 }
 0x698   : > { %v1172_v4 = vpop.permute.xlu1 %1171 }
 0x699   : > { %v1225_v5 = vpop.permute.xlu0 %1224  ;;  %v1174_v40 = vsel %vm3500_vm0, %v1170_v25, %v1172_v4  ;;  %vm3511_vm0 = vcmask 883712  }
 0x69a   : > { %v1228_v8 = vsel %vm3501_vm9, %v1223_v32, %v1225_v5  ;;  %1263 = vmatmul.bf16.vlgmr.msrb.gmra.mxu3 %v2145_v6  ;;  %1287 = vmatpush.bf16.msra.mxu1 %v1174_v40  ;;  %vm3512_vm9 = vcmask 891904  }
 0x69b   : > { %1276 = vmatpush.bf16.msra.mxu2 %v1228_v8 }
 0x69e   : > { %2150 = vmatmul.msk.bf16.vlgmr.msra.gmra.mxu2 %vm3503_vm11, %v2149_v42  ;;  %1288 = vmatpush.bf16.msra.mxu1 %v1163_v43  ;;  %vm3514_vm11 = vcmask 1031168  }
 0x69f   : > { %1311 = vmatpush.bf16.msrb.mxu2 %v1216_v60 }
 0x6a0   : > { %v1227_v44 = vpop.permute.xlu1 %1226 }
 0x6a1   : > { %v1150_v30 = vpop.permute.xlu0 %1149  ;;  %v1229_v45 = vsel %vm3504_vm12, %v1225_v5, %v1227_v44  ;;  %1332 = vmatpush.bf16.msra.mxu3 %v1227_v44  ;;  %vm3515_vm12 = vmmov %vm3505_vm13 }
 0x6a2   : > { %v1152_v27 = vsel %vm3505_vm13, %v1148_v51, %v1150_v30  ;;  %1304 = vmatpush.bf16.msrb.mxu0 %v1229_v45  ;;  %vm3516_vm13 = vmmov %vm3511_vm0 }
 0x6a3   : > { %1312 = vmatpush.bf16.msrb.mxu2 %v1205_v62  ;;  %1289 = vmatpush.bf16.msra.mxu1 %v1152_v27 }
 0x6a5   : > { %2151 = vmatmul.msk.bf16.vlgmr.msrb.gmra.mxu0 %vm3506_vm14, %v2149_v42  ;;  %vm3517_vm14 = vcmask 736256  }
 0x6a7   : > { %1313 = vmatpush.bf16.msrb.mxu2 %v1194_v16  ;;  %1290 = vmatpush.bf16.msra.mxu1 %v2972_v49 }
 0x6a9   : > { %v1241_v62 = vpop.permute.xlu0 %1240 }
 0x6aa   : > { %1291 = vmatmul.bf16.vlgmr.msra.gmra.mxu1 %v2145_v6  ;;  %2152 = vmatmul.msk.bf16.vlgmr.msra.gmra.mxu3 %vm3507_vm15, %v2149_v42 }
 0x6ab   : > { %1314 = vmatpush.bf16.msrb.mxu2 %v1183_v21 }
 0x6af   : > { %1315 = vmatpush.bf16.msrb.mxu2 %v1172_v4 }
 0x6b3   : > { %1316 = vmatpush.bf16.msrb.mxu2 %v1161_v41 }
 0x6b7   : > { %1317 = vmatpush.bf16.msrb.mxu2 %v1150_v30 }
 0x6bb   : > { %1318 = vmatpush.bf16.msrb.mxu2 %v2986_v54 }
 0x6be   : > { %1319 = vmatmul.bf16.vlgmr.msrb.gmra.mxu2 %v2145_v6 }
 0x71d   : > { %v1264_v46 = vpop.f32.mrf.mxu3 }
 0x71e   : > { %v1265_v53 = vadd.f32 %v1264_v46, %v1236_v50 }
 0x721   : > { %v1278_v47 = vpop.f32.mrf.mxu2 }
 0x722   : > { %v1279_v56 = vadd.f32 %v1278_v47, %v1265_v53  ;;  %v1306_v57 = vpop.f32.mrf.mxu0 }
 0x724   : > { %v1339_v49 = vsel %vm2739_vm2, %v1279_v56, 0.0 }
 0x725   : > { %v1266_v60 = vpop.f32.mrf.mxu3  ;;  %v1345_v11 = vmax.f32 %v1339_v49, 0.0 }
 0x726   : > { %v1267_v10 = vadd.f32 %v1266_v60, %v1241_v62  ;;  %v2156_v60 = vld [vmem:[%s3430_s5 + $0x18] sm:$0xff] }
 0x727   : > { %v1292_v58 = vpop.f32.mrf.mxu1 }
 0x728   : > { %v1293_v59 = vadd.f32 %v1292_v58, %v1236_v50 }
 0x729   : > { %v1280_v9 = vpop.f32.mrf.mxu2 }
 0x72a   : > { %v1307_v61 = vadd.f32 %v1306_v57, %v1293_v59  ;;  %v1281_v14 = vadd.f32 %v1280_v9, %v1267_v10  ;;  %v1308_v18 = vpop.f32.mrf.mxu0  ;;  %v2155_v59 = vld [vmem:[%s3430_s5 + $0x10] sm:$0xff] }
 0x72c   : > { %v1340_v54 = vsel %vm2735_vm1, %v1307_v61, 0.0  ;;  %v1342_v19 = vsel %vm2739_vm2, %v1281_v14, 0.0 }
 0x72d   : > { %v1346_v12 = vmax.f32 %v1340_v54, 0.0  ;;  %v1348_v22 = vmax.f32 %v1342_v19, 0.0  ;;  %v1334_v25 = vpop.f32.mrf.mxu3 }
 0x72f   : > { %v1294_v15 = vpop.f32.mrf.mxu1  ;;  %v1357_v16 = vpack.c.bf16 %v1346_v12, %v1345_v11 }
 0x730   : > { %v1295_v17 = vadd.f32 %v1294_v15, %v1241_v62 }
 0x731   : > { %1365 = vrot.lane.b32.xlu1 %v1357_v16, %s2422_s21 }
 0x732   : > { %v1309_v20 = vadd.f32 %v1308_v18, %v1295_v17 }
 0x734   : > { %v1343_v21 = vsel %vm2735_vm1, %v1309_v20, 0.0 }
 0x735   : > { %v1349_v23 = vmax.f32 %v1343_v21, 0.0  ;;  %v1336_v48 = vpop.f32.mrf.mxu3 }
 0x737   : > { %v1359_v24 = vpack.c.bf16 %v1349_v23, %v1348_v22 }
 0x739   : > { %1369 = vrot.lane.b32.xlu2 %v1359_v24, %s2422_s21 }
 0x741   : > { %v1320_v26 = vpop.f32.mrf.mxu2 }
 0x742   : > { %v1321_v28 = vadd.f32 %v1320_v26, %v1236_v50 }
 0x744   : > { %v1335_v29 = vadd.f32 %v1334_v25, %v1321_v28 }
 0x746   : > { %v1341_v34 = vsel %vm2748_vm3, %v1335_v29, 0.0 }
 0x747   : > { %v1347_v36 = vmax.f32 %v1341_v34, 0.0 }
 0x749   : > { %v1322_v32 = vpop.f32.mrf.mxu2  ;;  %v1358_v51 = vpack.c.bf16 %v1347_v36, %v1347_v36 }
 0x74a   : > { %v1323_v52 = vadd.f32 %v1322_v32, %v1241_v62 }
 0x74b   : > { %1367 = vrot.lane.b32.xlu0 %v1358_v51, %s2422_s21  ;;  %v2171_v51 = vld [vmem:[%s3429_s4 + $0x10] sm:$0xf] }
 0x74c   : > { %v1337_v39 = vadd.f32 %v1336_v48, %v1323_v52  ;;  %v2229_v52 = vld [vmem:[%s3429_s4 + $0x14] sm:$0xf0] }
 0x74e   : > { %v1344_v0 = vsel %vm2748_vm3, %v1337_v39, 0.0  ;;  %v2172_v39 = vor.u32 %v2229_v52, %v2171_v51 }
 0x74f   : > { %v1350_v6 = vmax.f32 %v1344_v0, 0.0 }
 0x751   : > { %v1360_v7 = vpack.c.bf16 %v1350_v6, %v1350_v6  ;;  %v2228_v6 = vld [vmem:[%s3429_s4 + $0x14] sm:$0xf] }
 0x753   : > { %1371 = vrot.lane.b32.xlu1 %v1360_v7, %s2422_s21  ;;  %v2173_v7 = vld [vmem:[%s3429_s4 + $0x18] sm:$0xf0] }
 0x793   : > { %v1370_v63 = vpop.permute.xlu2 %1369 }
 0x794   : > { %v1374_v4 = vrot.slane %v1370_v63, 4 }
 0x796   : > { %v1377_v5 = vsel %vm471_vm4, %v1374_v4, %v1370_v63 }
 0x797   : > { %1385 = vst.msk [vmem:[#allocation2 + $0xc] sm:$0xff] %vm2623_vm5, %v1377_v5  ;;  %v2176_v5 = vor.u32 %v2228_v6, %v2173_v7  ;;  %v2180_v7 = vld [vmem:[%s3431_s6 + $0x10] sm:$0xff] }
 0x79e   : > { %v2231_v42 = vld [vmem:[#allocation2 + $0x8] sm:$0xf0]  ;;  %v2161_v30 = vld [vmem:[#allocation2 + $0xc] sm:$0xf0] }
 0x7a3   : > { %v1366_v40 = vpop.permute.xlu1 %1365 }
 0x7a4   : > { %v1373_v41 = vrot.slane %v1366_v40, 4 }
 0x7a6   : > { %v1375_v8 = vsel %vm471_vm4, %v1373_v41, %v1366_v40 }
 0x7a7   : > { %1383 = vst.msk [vmem:[#allocation2] sm:$0xff] %vm2623_vm5, %v1375_v8 }
 0x7ae   : > { %v2159_v43 = vld [vmem:[#allocation2] sm:$0xf]  ;;  %v2230_v44 = vld [vmem:[#allocation2 + $0x4] sm:$0xf] }
 0x7af   : > { %v3086_v45 = vor.u32 %v2231_v42, %v2159_v43  ;;  %v3088_v27 = vor.u32 %v2230_v44, %v2161_v30 }
 0x7b1   : > { %1462 = vrot.lane.b32.xlu1 %v3086_v45, %s3470_s27  ;;  %1473 = vrot.lane.b32.xlu2 %v3086_v45, %s3468_s13 }
 0x7b2   : > { %1475 = vrot.lane.b32.xlu0 %v3088_v27, %s3468_s13 }
 0x7b9   : > { %1451 = vrot.lane.b32.xlu1 %v3086_v45, %s3466_s15  ;;  %1464 = vrot.lane.b32.xlu2 %v3088_v27, %s3470_s27 }
 0x7ba   : > { %1484 = vrot.lane.b32.xlu0 %v3086_v45, %s3492_s26 }
 0x7bd   : > { %v1368_v46 = vpop.permute.xlu0 %1367 }
 0x7be   : > { %v1376_v47 = vsel %vm471_vm4, %v1373_v41, %v1368_v46 }
 0x7bf   : > { %1384 = vst.msk [vmem:[#allocation2 + $0x8] sm:$0xf] %vm484_vm6, %v1376_v47 }
 0x7c1   : > { %1440 = vrot.lane.b32.xlu1 %v3086_v45, %s3508_s28  ;;  %1453 = vrot.lane.b32.xlu2 %v3088_v27, %s3466_s15 }
 0x7c5   : > { %v1372_v50 = vpop.permute.xlu1 %1371 }
 0x7c6   : > { %v1378_v53 = vsel %vm471_vm4, %v1374_v4, %v1372_v50  ;;  %v2167_v56 = vld [vmem:[#allocation2 + $0x8] sm:$0xf] }
 0x7c7   : > { %1386 = vst.msk [vmem:[#allocation2 + $0x14] sm:$0xf] %vm484_vm6, %v1378_v53 }
 0x7c9   : > { %1429 = vrot.lane.b32.xlu1 %v3086_v45, %s3509_s29  ;;  %1442 = vrot.lane.b32.xlu2 %v3088_v27, %s3508_s28 }
 0x7ce   : > { %v2232_v57 = vld [vmem:[#allocation2 + $0x10] sm:$0xf0] }
 0x7cf   : > { %v3114_v58 = vor.u32 %v2232_v57, %v2167_v56 }
 0x7d1   : > { %1477 = vrot.lane.b32.xlu0 %v3114_v58, %s3468_s13  ;;  %1418 = vrot.lane.b32.xlu1 %v3086_v45, %s3510_s17 }
 0x7d2   : > { %1431 = vrot.lane.b32.xlu2 %v3088_v27, %s3509_s29 }
 0x7d9   : > { %1466 = vrot.lane.b32.xlu0 %v3114_v58, %s3470_s27  ;;  %1407 = vrot.lane.b32.xlu1 %v3086_v45, %s3491_s16  ;;  %s2241_s27 = smul.u32 48, %s2519_s25 }
 0x7da   : > { %1420 = vrot.lane.b32.xlu2 %v3088_v27, %s3510_s17 }
 0x7e1   : > { %1455 = vrot.lane.b32.xlu0 %v3114_v58, %s3466_s15  ;;  %1486 = vrot.lane.b32.xlu1 %v3088_v27, %s3492_s26  ;;  %s3551_s15 = sld [smem:[#allocation15_spill]] }
 0x7e2   : > { %1409 = vrot.lane.b32.xlu2 %v3088_v27, %s3491_s16 }
 0x7e9   : > { %1444 = vrot.lane.b32.xlu0 %v3114_v58, %s3508_s28  ;;  %1488 = vrot.lane.b32.xlu1 %v3114_v58, %s3492_s26 }
 0x7ea   : > { %1422 = vrot.lane.b32.xlu2 %v3114_v58, %s3510_s17 }
 0x7f1   : > { %1433 = vrot.lane.b32.xlu0 %v3114_v58, %s3509_s29 }
 0x7f2   : > { %1497 = vperm.xlu2 %2303, %v2155_v59  }
 0x7f9   : > { %1411 = vrot.lane.b32.xlu0 %v3114_v58, %s3491_s16 }
 0x801   : > { %1502 = vperm.xlu0 %2304, %v2156_v60  }
 0x80b   : > { %v1474_v49 = vpop.permute.xlu2 %1473 }
 0x813   : > { %v1465_v61 = vpop.permute.xlu2 %1464 }
 0x81b   : > { %v1454_v62 = vpop.permute.xlu2 %1453 }
 0x823   : > { %v1463_v9 = vpop.permute.xlu1 %1462  ;;  %v1443_v15 = vpop.permute.xlu2 %1442 }
 0x824   : > { %v1476_v10 = vpop.permute.xlu0 %1475  ;;  %v1468_v11 = vsel %vm574_vm8, %v1463_v9, %v1465_v61 }
 0x825   : > { %v1479_v54 = vsel %vm586_vm7, %v1474_v49, %v1476_v10 }
 0x826   : > { %1517 = vmatpush.bf16.msra.mxu0 %v1479_v54 }
 0x82a   : > { %1518 = vmatpush.bf16.msra.mxu0 %v1468_v11 }
 0x82b   : > { %v1452_v12 = vpop.permute.xlu1 %1451 }
 0x82c   : > { %v1457_v14 = vsel %vm3511_vm0, %v1452_v12, %v1454_v62  ;;  %v1432_v18 = vpop.permute.xlu2 %1431  ;;  %v1485_v19 = vpop.permute.xlu0 %1484  ;;  %vm3518_vm0 = vmmov %vm3512_vm9 }
 0x82e   : > { %1519 = vmatpush.bf16.msra.mxu0 %v1457_v14 }
 0x833   : > { %v1441_v16 = vpop.permute.xlu1 %1440 }
 0x834   : > { %v1446_v17 = vsel %vm3512_vm9, %v1441_v16, %v1443_v15  ;;  %v1421_v23 = vpop.permute.xlu2 %1420  ;;  %vm3519_vm9 = vmmov %vm3517_vm14 }
 0x835   : > { %1520 = vmatpush.bf16.msra.mxu0 %v1446_v17 }
 0x83b   : > { %v1430_v20 = vpop.permute.xlu1 %1429 }
 0x83c   : > { %v1435_v21 = vsel %vm3513_vm10, %v1430_v20, %v1432_v18  ;;  %v1410_v34 = vpop.permute.xlu2 %1409  ;;  %vm3520_vm10 = vmmov %vm3507_vm15 }
 0x83d   : > { %1521 = vmatpush.bf16.msra.mxu0 %v1435_v21 }
 0x843   : > { %v1478_v22 = vpop.permute.xlu0 %1477  ;;  %v1419_v25 = vpop.permute.xlu1 %1418 }
 0x844   : > { %v1480_v24 = vsel %vm586_vm7, %v1476_v10, %v1478_v22  ;;  %v1424_v26 = vsel %vm3514_vm11, %v1419_v25, %v1421_v23  ;;  %vm3521_vm11 = vcmask 900096   ;;  %v1423_v30 = vpop.permute.xlu2 %1422 }
 0x845   : > { %1545 = vmatpush.bf16.msrb.mxu3 %v1480_v24  ;;  %1522 = vmatpush.bf16.msra.mxu0 %v1424_v26 }
 0x84b   : > { %v1467_v28 = vpop.permute.xlu0 %1466  ;;  %v1408_v36 = vpop.permute.xlu1 %1407 }
 0x84c   : > { %v1469_v29 = vsel %vm574_vm8, %v1465_v61, %v1467_v28  ;;  %v1413_v32 = vsel %vm3515_vm12, %v1408_v36, %v1410_v34  ;;  %vm3522_vm12 = vmmov %vm3520_vm10  ;;  %v1498_v59 = vpop.permute.xlu2 %1497 }
 0x84d   : > { %1546 = vmatpush.bf16.msrb.mxu3 %v1469_v29  ;;  %1523 = vmatpush.bf16.msra.mxu0 %v1413_v32 }
 0x851   : > { %1524 = vmatpush.bf16.msra.mxu0 %v3086_v45 }
 0x853   : > { %v1456_v48 = vpop.permute.xlu0 %1455  ;;  %v1487_v63 = vpop.permute.xlu1 %1486 }
 0x854   : > { %v1458_v0 = vsel %vm3516_vm13, %v1454_v62, %v1456_v48  ;;  %v1490_v4 = vsel %vm3517_vm14, %v1485_v19, %v1487_v63  ;;  %1525 = vmatmul.bf16.vlgmr.msra.gmra.mxu0 %v2172_v39  ;;  %vm3523_vm13 = vcmask 1031168   ;;  %vm3524_vm14 = vcmask 1039360  }
 0x855   : > { %1547 = vmatpush.bf16.msrb.mxu3 %v1458_v0  ;;  %1538 = vmatpush.bf16.msrb.mxu1 %v1490_v4  ;;  %v1425_v45 = vsel %vm3523_vm13, %v1421_v23, %v1423_v30 }
 0x858   : > { %2177 = vmatmul.msk.bf16.vlgmr.msrb.gmra.mxu1 %vm3507_vm15, %v2176_v5  ;;  %vm3525_vm15 = vcmask 556032  }
 0x859   : > { %1573 = vmatpush.bf16.msra.mxu1 %v1478_v22 }
 0x85b   : > { %v1445_v40 = vpop.permute.xlu0 %1444  ;;  %v1489_v8 = vpop.permute.xlu1 %1488 }
 0x85c   : > { %v1447_v41 = vsel %vm3518_vm0, %v1443_v15, %v1445_v40  ;;  %v1491_v42 = vsel %vm3519_vm9, %v1487_v63, %v1489_v8  ;;  %1594 = vmatpush.bf16.msrb.mxu0 %v1489_v8  ;;  %vm3526_vm0 = vmmov %vm3525_vm15  ;;  %v2181_v63 = vld [vmem:[%s3431_s6 + $0x18] sm:$0xff]  ;;  %vm3527_vm9 = vcmask 31744  }
 0x85d   : > { %1548 = vmatpush.bf16.msrb.mxu3 %v1447_v41  ;;  %1574 = vmatpush.bf16.msra.mxu1 %v1467_v28 }
 0x85e   : > { %1566 = vmatpush.bf16.msra.mxu2 %v1491_v42 }
 0x861   : > { %1575 = vmatpush.bf16.msra.mxu1 %v1456_v48  ;;  %2178 = vmatmul.msk.bf16.vlgmr.msra.gmra.mxu2 %vm3520_vm10, %v2176_v5  ;;  %vm3528_vm10 = vmmov %vm3527_vm9 }
 0x863   : > { %v1434_v43 = vpop.permute.xlu0 %1433 }
 0x864   : > { %v1436_v44 = vsel %vm3521_vm11, %v1432_v18, %v1434_v43  ;;  %2179 = vmatmul.msk.bf16.vlgmr.msrb.gmra.mxu0 %vm3522_vm12, %v2176_v5  ;;  %vm3529_vm11 = vmmov %vm3527_vm9 }
 0x865   : > { %1549 = vmatpush.bf16.msrb.mxu3 %v1436_v44  ;;  %1576 = vmatpush.bf16.msra.mxu1 %v1445_v40  ;;  %vm3530_vm12 = vmmov %vm3527_vm9 }
 0x869   : > { %1550 = vmatpush.bf16.msrb.mxu3 %v1425_v45  ;;  %1577 = vmatpush.bf16.msra.mxu1 %v1434_v43 }
 0x86b   : > { %v1412_v46 = vpop.permute.xlu0 %1411 }
 0x86c   : > { %v1414_v47 = vsel %vm3524_vm14, %v1410_v34, %v1412_v46 }
 0x86d   : > { %1551 = vmatpush.bf16.msrb.mxu3 %v1414_v47  ;;  %1578 = vmatpush.bf16.msra.mxu1 %v1423_v30 }
 0x871   : > { %1552 = vmatpush.bf16.msrb.mxu3 %v3088_v27  ;;  %1579 = vmatpush.bf16.msra.mxu1 %v1412_v46 }
 0x873   : > { %v1503_v16 = vpop.permute.xlu0 %1502 }
 0x874   : > { %1553 = vmatmul.bf16.vlgmr.msrb.gmra.mxu3 %v2172_v39 }
 0x875   : > { %1580 = vmatpush.bf16.msra.mxu1 %v3114_v58 }
 0x878   : > { %1581 = vmatmul.bf16.vlgmr.msra.gmra.mxu1 %v2172_v39 }
 0x8d1   : > { %v1526_v50 = vpop.f32.mrf.mxu0 }
 0x8d2   : > { %v1527_v61 = vadd.f32 %v1526_v50, %v1498_v59  ;;  %v2182_v50 = vld [vmem:[%s3432_s7 + $0x1] sm:$0x1] }
 0x8d5   : > { %v1540_v53 = vpop.f32.mrf.mxu1 }
 0x8d6   : > { %v1541_v54 = vadd.f32 %v1540_v53, %v1527_v61 }
 0x8d8   : > { %v3190_v58 = vsel %vm2739_vm2, %v1541_v54, 0.0  ;;  %v2186_v54 = vld [vmem:[%s3434_s9 + $0x18] sm:$0xff] }
 0x8d9   : > { %v1528_v56 = vpop.f32.mrf.mxu0 }
 0x8da   : > { %v1529_v19 = vadd.f32 %v1528_v56, %v1503_v16 }
 0x8dd   : > { %v1542_v57 = vpop.f32.mrf.mxu1 }
 0x8de   : > { %v1543_v25 = vadd.f32 %v1542_v57, %v1529_v19 }
 0x8e0   : > { %v3206_v32 = vsel %vm2739_vm2, %v1543_v25, 0.0 }
 0x8e1   : > { %v1596_v60 = vpop.f32.mrf.mxu0 }
 0x8e4   : > { %v1568_v9 = vpop.f32.mrf.mxu2 }
 0x8e9   : > { %v1598_v22 = vpop.f32.mrf.mxu0 }
 0x8ec   : > { %v1570_v29 = vpop.f32.mrf.mxu2 }
 0x8f5   : > { %v1582_v49 = vpop.f32.mrf.mxu1 }
 0x8f6   : > { %v1583_v62 = vadd.f32 %v1582_v49, %v1498_v59 }
 0x8f7   : > { %v1554_v10 = vpop.f32.mrf.mxu3 }
 0x8f8   : > { %v1597_v11 = vadd.f32 %v1596_v60, %v1583_v62  ;;  %v1555_v12 = vadd.f32 %v1554_v10, %v1498_v59  ;;  %v2184_v59 = vld [vmem:[%s3433_s8 + $0x18] sm:$0xff]  ;;  %v2183_v60 = vld [vmem:[%s3433_s8 + $0x10] sm:$0xff] }
 0x8fa   : > { %v1569_v27 = vadd.f32 %v1568_v9, %v1555_v12  ;;  %v3186_v14 = vsel %vm2748_vm3, %v1597_v11, 0.0  ;;  %v2185_v11 = vld [vmem:[%s3434_s9 + $0x10] sm:$0xff] }
 0x8fb   : > { %v1608_v21 = vsel %vm3525_vm15, %v3186_v14, 0.0 }
 0x8fc   : > { %v3194_v15 = vsel %vm2735_vm1, %v1569_v27, 0.0 }
 0x8fd   : > { %v1584_v17 = vpop.f32.mrf.mxu1  ;;  %v1607_v18 = vadd.f32 %v3194_v15, %v3190_v58 }
 0x8fe   : > { %v1585_v20 = vadd.f32 %v1584_v17, %v1503_v16 }
 0x8ff   : > { %v1556_v23 = vpop.f32.mrf.mxu3  ;;  %v1609_v24 = vadd.f32 %v1608_v21, %v1607_v18 }
 0x900   : > { %v1599_v26 = vadd.f32 %v1598_v22, %v1585_v20  ;;  %v1557_v28 = vadd.f32 %v1556_v23, %v1503_v16 }
 0x901   : > { %1610 = vadd.xlane.f32.xlu1 %v1609_v24 }
 0x902   : > { %v1571_v34 = vadd.f32 %v1570_v29, %v1557_v28  ;;  %v3202_v36 = vsel %vm2748_vm3, %v1599_v26, 0.0 }
 0x903   : > { %v1613_v48 = vsel %vm3526_vm0, %v3202_v36, 0.0 }
 0x904   : > { %v3210_v51 = vsel %vm2735_vm1, %v1571_v34, 0.0 }
 0x905   : > { %v1612_v52 = vadd.f32 %v3210_v51, %v3206_v32 }
 0x907   : > { %v1614_v39 = vadd.f32 %v1613_v48, %v1612_v52 }
 0x909   : > { %1615 = vadd.xlane.f32.xlu2 %v1614_v39 }
 0x974   : > { %v1611_v0 = vpop.xlane.xlu1 %1610 }
 0x975   : > { %v1617_v6 = vmul.f32 0.00390625, %v1611_v0 }
 0x977   : > { %v1622_v5 = vmul.f32 %v2180_v7, %v1617_v6 }
 0x979   : > { %v1624_v8 = vsel %vm3527_vm9, %v1622_v5, 0.0 }
 0x97c   : > { %v1616_v4 = vpop.xlane.xlu2 %1615 }
 0x97d   : > { %v1618_v40 = vmul.f32 0.00390625, %v1616_v4 }
 0x97f   : > { %v1623_v41 = vmul.f32 %v2181_v63, %v1618_v40 }
 0x981   : > { %v1625_v42 = vsel %vm3528_vm10, %v1623_v41, 0.0 }
 0x982   : > { %v1626_v43 = vadd.f32 %v1625_v42, %v1624_v8 }
 0x984   : > { %v1627_v44 = vrot.slane %v1626_v43, 4 }
 0x986   : > { %v1628_v30 = vadd.f32 %v1627_v44, %v1626_v43 }
 0x988   : > { %v1629_v45 = vrot.slane %v1628_v30, 2 }
 0x98a   : > { %v1630_v46 = vadd.f32 %v1629_v45, %v1628_v30 }
 0x98c   : > { %v1631_v47 = vrot.slane %v1630_v46, 1 }
 0x98e   : > { %v1632_v53 = vadd.f32 %v1631_v47, %v1630_v46 }
 0x990   : > { %v1635_v56 = vadd.f32 %v2182_v50, %v1632_v53 }
 0x992   : > { %v1636_v57 = vmax.f32 %v1635_v56, 0.0 }
 0x994   : > { %v1640_v49 = vperm.slane %v1636_v57, 0 }
 0x996   : > { %v1642_v61 = vmul.f32 %v2184_v59, %v1640_v49  ;;  %v1641_v62 = vmul.f32 %v2183_v60, %v1640_v49 }
 0x998   : > { %v1646_v9 = vsel %vm3529_vm11, %v1642_v61, 0.0  ;;  %v1643_v10 = vsel %vm3530_vm12, %v1641_v62, 0.0 }
 0x999   : > { %1647 = vadd.xlane.f32.xlu1 %v1646_v9  ;;  %1644 = vadd.xlane.f32.xlu0 %v1643_v10 }
 0xa0c   : > { %v1648_v12 = vpop.xlane.xlu1 %1647  ;;  %v1645_v27 = vpop.xlane.xlu0 %1644 }
 0xa0d   : > { %v1653_v16 = vadd.f32 %v2186_v54, %v1648_v12  ;;  %v1652_v17 = vadd.f32 %v2185_v11, %v1645_v27 }
 0xa0f   : > { %v1655_v18 = vsub.f32 0.0, %v1653_v16  ;;  %v1654_v19 = vsub.f32 0.0, %v1652_v17 }
 0xa11   : > { %v1658_v20 = vmul.f32 1.442695, %v1655_v18  ;;  %v1656_v21 = vmul.f32 1.442695, %v1654_v19 }
 0xa13   : > { %2313 = vpow2.f32 %v1658_v20 }
 0xa14   : > { %2315 = vpow2.f32 %v1656_v21 }
 0xa19   : > { %v2314_v22 = vpop.eup %2313 }
 0xa1a   : > { %v2316_v23 = vpop.eup %2315  ;;  %v1661_v24 = vadd.f32 1.0, %v2314_v22  ;;  %v1716_v22 = vld [vmem:[%s3436_s11] sm:$0xff] }
 0xa1b   : > { %v1660_v25 = vadd.f32 1.0, %v2316_v23  ;;  %v1717_v23 = vld [vmem:[%s3436_s11 + $0x8] sm:$0xff] }
 0xa1c   : > { %2317 = vrcp.f32 %v1661_v24  ;;  %v1688_v48 = vand.u32 2147483648, %v1661_v24  ;;  %v1686_v6 = vand.u32 2147483647, %v1661_v24  ;;  %vm1682_vm15 = vweird.f32 %v1661_v24 }
 0xa1d   : > { %2319 = vrcp.f32 %v1660_v25  ;;  %v1673_v7 = vand.u32 2147483648, %v1660_v25  ;;  %v1671_v4 = vand.u32 2147483647, %v1660_v25  ;;  %vm1667_vm9 = vweird.f32 %v1660_v25 }
 0xa1e   : > { %v1689_v40 = vor.u32 1.1754944e-38, %v1688_v48  ;;  %vm1687_vm10 = vcmp.eq.f32.partialorder %v1686_v6, 8.507059e+37 }
 0xa1f   : > { %v1674_v42 = vor.u32 1.1754944e-38, %v1673_v7  ;;  %vm1672_vm12 = vcmp.eq.f32.partialorder %v1671_v4, 8.507059e+37 }
 0xa22   : > { %v2318_v26 = vpop.eup %2317 }
 0xa23   : > { %v2320_v28 = vpop.eup %2319  ;;  %v1678_v29 = vmul.f32 %v2318_v26, %v1661_v24  ;;  %vm1683_vm13 = vweird.f32 %v2318_v26 }
 0xa24   : > { %v1663_v34 = vmul.f32 %v2320_v28, %v1660_v25  ;;  %vm1668_vm14 = vweird.f32 %v2320_v28  ;;  %vm1684_vm0 = vmor %vm1682_vm15, %vm1683_vm13  ;;  %vm3537_vm13 = vcmask 1031168   ;;  %vm3540_vm15 = vcmask 1039360  }
 0xa25   : > { %v1679_v52 = vsub.f32 1.0, %v1678_v29  ;;  %vm1669_vm11 = vmor %vm1667_vm9, %vm1668_vm14  ;;  %vm3543_vm9 = vcmask 130048  }
 0xa26   : > { %v1664_v39 = vsub.f32 1.0, %v1663_v34 }
 0xa27   : > { %v1680_v0 = vmul.f32 %v2318_v26, %v1679_v52 }
 0xa28   : > { %v1665_v63 = vmul.f32 %v2320_v28, %v1664_v39 }
 0xa29   : > { %v1681_v5 = vadd.f32 %v2318_v26, %v1680_v0 }
 0xa2a   : > { %v1666_v41 = vadd.f32 %v2320_v28, %v1665_v63 }
 0xa2b   : > { %v1685_v8 = vsel %vm1684_vm0, %v2318_v26, %v1681_v5 }
 0xa2c   : > { %v1690_v43 = vsel %vm1687_vm10, %v1689_v40, %v1685_v8  ;;  %v1670_v44 = vsel %vm1669_vm11, %v2320_v28, %v1666_v41  ;;  %vm3545_vm11 = vmmov %vm3537_vm13 }
 0xa2d   : > { %1699 = vperm.xlu0 %2304, %v1690_v43   ;;  %v1675_v30 = vsel %vm1672_vm12, %v1674_v42, %v1670_v44  ;;  %vm3546_vm12 = vmmov %vm3540_vm15 }
 0xa2e   : > { %1694 = vperm.xlu2 %2303, %v1675_v30  }
 0xa88   : > { %v1695_v45 = vpop.permute.xlu2 %1694 }
 0xa89   : > { %v1702_v46 = vmul.f32 %v1695_v45, %v3190_v58  ;;  %v1703_v47 = vmul.f32 %v1695_v45, %v3194_v15  ;;  %v1704_v50 = vmul.f32 %v1695_v45, %v3186_v14 }
 0xa8b   : > { %v1708_v53 = vadd.f32 %v1702_v46, %v2927_v31  ;;  %v1709_v56 = vadd.f32 %v1703_v47, %v2930_v33  ;;  %v1710_v57 = vadd.f32 %v1704_v50, %v2937_v37 }
 0xa8d   : > { %v1719_v59 = vpack.c.bf16 %v1710_v57, %v1710_v57  ;;  %v1718_v60 = vpack.c.bf16 %v1709_v56, %v1708_v53 }
 0xa8f   : > { %1728 = vrot.lane.b32.xlu2 %v1719_v59, %s2422_s21  ;;  %1726 = vrot.lane.b32.xlu1 %v1718_v60, %s2422_s21  ;;  %v2201_v60 = vld [vmem:[%s3435_s10] sm:$0xf] }
 0xa9f   : > { %v1700_v49 = vpop.permute.xlu0 %1699 }
 0xaa0   : > { %v1705_v61 = vmul.f32 %v1700_v49, %v3206_v32  ;;  %v1706_v58 = vmul.f32 %v1700_v49, %v3210_v51  ;;  %v1707_v15 = vmul.f32 %v1700_v49, %v3202_v36  ;;  %v2234_v49 = vld [vmem:[%s3435_s10 + $0x4] sm:$0xf0] }
 0xaa2   : > { %v1711_v14 = vadd.f32 %v1705_v61, %v2942_v1  ;;  %v1712_v31 = vadd.f32 %v1706_v58, %v2945_v2  ;;  %v1713_v33 = vadd.f32 %v1707_v15, %v2955_v3  ;;  %v2202_v61 = vor.u32 %v2234_v49, %v2201_v60  ;;  %v2233_v58 = vld [vmem:[%s3435_s10 + $0x4] sm:$0xf]  ;;  %v2203_v15 = vld [vmem:[%s3435_s10 + $0x8] sm:$0xf0] }
 0xaa4   : > { %v1721_v37 = vpack.c.bf16 %v1713_v33, %v1713_v33  ;;  %v1720_v62 = vpack.c.bf16 %v1712_v31, %v1711_v14 }
 0xaa6   : > { %1732 = vrot.lane.b32.xlu1 %v1721_v37, %s2422_s21  ;;  %1730 = vrot.lane.b32.xlu0 %v1720_v62, %s2422_s21  ;;  %s3531_s21 = smov 92   ;;  %v2206_v62 = vor.u32 %v2233_v58, %v2203_v15 }
 0xae9   : > { %v1729_v54 = vpop.permute.xlu2 %1728 }
 0xb01   : > { %v1727_v9 = vpop.permute.xlu1 %1726 }
 0xb02   : > { %v1734_v10 = vrot.slane %v1727_v9, 4 }
 0xb04   : > { %v1736_v32 = vsel %vm471_vm4, %v1734_v10, %v1727_v9  ;;  %v1737_v51 = vsel %vm471_vm4, %v1734_v10, %v1729_v54 }
 0xb05   : > { %1744 = vst.msk [vmem:[#allocation2] sm:$0xff] %vm2623_vm5, %v1736_v32 }
 0xb06   : > { %1745 = vst.msk [vmem:[#allocation2 + $0x8] sm:$0xf] %vm484_vm6, %v1737_v51 }
 0xb0c   : > { %v2189_v12 = vld [vmem:[#allocation2] sm:$0xf]  ;;  %v2235_v16 = vld [vmem:[#allocation2 + $0x4] sm:$0xf] }
 0xb0d   : > { %v2197_v20 = vld [vmem:[#allocation2 + $0x8] sm:$0xf] }
 0xb18   : > { %v1731_v1 = vpop.permute.xlu0 %1730  ;;  %v1733_v3 = vpop.permute.xlu1 %1732 }
 0xb19   : > { %v1735_v2 = vrot.slane %v1731_v1, 4 }
 0xb1b   : > { %v1738_v36 = vsel %vm471_vm4, %v1735_v2, %v1731_v1  ;;  %v1739_v11 = vsel %vm471_vm4, %v1735_v2, %v1733_v3  ;;  %vm3534_vm4 = vcmask 883712  }
 0xb1c   : > { %1746 = vst.msk [vmem:[#allocation2 + $0xc] sm:$0xff] %vm2623_vm5, %v1738_v36  ;;  %vm3535_vm5 = vcmask 891904   ;;  %vm3538_vm14 = vmmov %vm3534_vm4 }
 0xb1d   : > { %1747 = vst.msk [vmem:[#allocation2 + $0x14] sm:$0xf] %vm484_vm6, %v1739_v11  ;;  %vm3536_vm6 = vcmask 900096  }
 0xb1e   : > { %vm3542_vm0 = vmmov %vm3536_vm6 }
 0xb23   : > { %v2236_v27 = vld [vmem:[#allocation2 + $0x8] sm:$0xf0]  ;;  %v2191_v17 = vld [vmem:[#allocation2 + $0xc] sm:$0xf0] }
 0xb24   : > { %v3267_v18 = vor.u32 %v2236_v27, %v2189_v12  ;;  %v3269_v19 = vor.u32 %v2235_v16, %v2191_v17  ;;  %v2237_v13 = vld [vmem:[#allocation2 + $0x10] sm:$0xf0]  ;;  %v1968_v27 = vld [vmem:[%s2580_s14] sm:$0xff] }
 0xb25   : > { %v3283_v21 = vor.u32 %v2237_v13, %v2197_v20 }
 0xb26   : > { %1823 = vrot.lane.b32.xlu1 %v3267_v18, %s3531_s21  ;;  %1834 = vrot.lane.b32.xlu0 %v3267_v18, %s3532_s20 }
 0xb27   : > { %1836 = vrot.lane.b32.xlu2 %v3269_v19, %s3532_s20 }
 0xb2e   : > { %1814 = vrot.lane.b32.xlu1 %v3269_v19, %s3533_s30  ;;  %1825 = vrot.lane.b32.xlu0 %v3269_v19, %s3531_s21 }
 0xb2f   : > { %1812 = vrot.lane.b32.xlu2 %v3267_v18, %s3533_s30 }
 0xb36   : > { %1838 = vrot.lane.b32.xlu1 %v3283_v21, %s3532_s20  ;;  %1801 = vrot.lane.b32.xlu0 %v3267_v18, %s3508_s28  ;;  %s3549_s20 = smul.u32 48, %s2574_s18 }
 0xb37   : > { %1803 = vrot.lane.b32.xlu2 %v3269_v19, %s3508_s28 }
 0xb3e   : > { %1827 = vrot.lane.b32.xlu1 %v3283_v21, %s3531_s21  ;;  %1790 = vrot.lane.b32.xlu0 %v3267_v18, %s3509_s29 }
 0xb3f   : > { %1792 = vrot.lane.b32.xlu2 %v3269_v19, %s3509_s29 }
 0xb46   : > { %1816 = vrot.lane.b32.xlu1 %v3283_v21, %s3533_s30  ;;  %1779 = vrot.lane.b32.xlu0 %v3267_v18, %s3510_s17  ;;  %s3366_s30 = scalar_lea.vmem [#allocation6], %s3549_s20 }
 0xb47   : > { %1781 = vrot.lane.b32.xlu2 %v3269_v19, %s3510_s17 }
 0xb4e   : > { %1845 = vrot.lane.b32.xlu1 %v3267_v18, %s3492_s26  ;;  %1768 = vrot.lane.b32.xlu0 %v3267_v18, %s3491_s16 }
 0xb4f   : > { %1770 = vrot.lane.b32.xlu2 %v3269_v19, %s3491_s16 }
 0xb56   : > { %1794 = vrot.lane.b32.xlu1 %v3283_v21, %s3509_s29  ;;  %1847 = vrot.lane.b32.xlu0 %v3269_v19, %s3492_s26 }
 0xb57   : > { %1805 = vrot.lane.b32.xlu2 %v3283_v21, %s3508_s28 }
 0xb5e   : > { %1849 = vrot.lane.b32.xlu1 %v3283_v21, %s3492_s26  ;;  %1783 = vrot.lane.b32.xlu0 %v3283_v21, %s3510_s17  ;;  %s1999_s26 = sshll.u32 %s3366_s30, 4  ;;  %s1987_s17 = scalar_lea.sflag [#allocation5], %s2574_s18  ;;  %s2000_s26 = int_to_ptr.vmem [resolvable:$true] %s1999_s26 }
 0xb5f   : > { %1772 = vrot.lane.b32.xlu2 %v3283_v21, %s3491_s16  ;;  %s1998_s16 = scalar_lea.hbm %s3551_s15, %s2241_s27 }
 0xb60   : > { %s2001_s25 = sshll.u32 %s1998_s16, 4  ;;  %s2002_s25 = int_to_ptr.hbm [resolvable:$true] %s2001_s25 }
 0xb61   : > { %s2365_s12 = sshra.s32 %s2002_s25, 4  ;;  %s2366_s12 = int_to_ptr.hbm [resolvable:$true] %s2365_s12 }
 0xb62   : > { %s2367_s19 = scalar_lea.hbm %s2366_s12, 48  ;;  %p2372_p3 = scmp.lt.s32.totalorder %s2366_s12, %s3551_s15 }
 0xb63   : > { %p2368_p6 = scmp.ne.s32.totalorder %s2366_s12, %s2367_s19 }
 0xb65   : > { %p2369_p13 = pnand %p2368_p6, %p2544_p11 }
 0xb66   : > { %1858 = vperm.xlu0 %2304, %v1716_v22  }
 0xb67   : > { %1863 = vperm.xlu2 %2303, %v1717_v23   ;;  %v1971_v23 = vld [vmem:[%s2580_s14 + $0x18] sm:$0xff]  ;;  %p2370_p2 = pneg %p2369_p13 }
 0xb81   : > { %v1837_v24 = vpop.permute.xlu2 %1836 }
 0xb89   : > { %v1813_v25 = vpop.permute.xlu2 %1812 }
 0xb91   : > { %v1804_v26 = vpop.permute.xlu2 %1803 }
 0xb98   : > { %v1824_v28 = vpop.permute.xlu1 %1823  ;;  %v1835_v29 = vpop.permute.xlu0 %1834 }
 0xb99   : > { %v1840_v34 = vsel %vm586_vm7, %v1835_v29, %v1837_v24  ;;  %v1793_v52 = vpop.permute.xlu2 %1792 }
 0xb9a   : > { %1878 = vmatpush.bf16.msrb.mxu2 %v1840_v34  ;;  %v1969_v34 = vld [vmem:[%s2580_s14 + $0x8] sm:$0xff] }
 0xba0   : > { %v1815_v48 = vpop.permute.xlu1 %1814  ;;  %v1826_v39 = vpop.permute.xlu0 %1825 }
 0xba1   : > { %v1829_v0 = vsel %vm574_vm8, %v1824_v28, %v1826_v39  ;;  %v1782_v6 = vpop.permute.xlu2 %1781  ;;  %v1818_v7 = vsel %vm3534_vm4, %v1813_v25, %v1815_v48  ;;  %vm3547_vm4 = vmmov %vm3543_vm9 }
 0xba2   : > { %1879 = vmatpush.bf16.msrb.mxu2 %v1829_v0 }
 0xba6   : > { %1880 = vmatpush.bf16.msrb.mxu2 %v1818_v7 }
 0xba8   : > { %v1839_v63 = vpop.permute.xlu1 %1838  ;;  %v1802_v4 = vpop.permute.xlu0 %1801 }
 0xba9   : > { %v1841_v5 = vsel %vm586_vm7, %v1837_v24, %v1839_v63  ;;  %v1807_v40 = vsel %vm3535_vm5, %v1802_v4, %v1804_v26  ;;  %v1771_v41 = vpop.permute.xlu2 %1770  ;;  %vm3539_vm7 = vmmov %vm3535_vm5 }
 0xbaa   : > { %1881 = vmatpush.bf16.msrb.mxu2 %v1807_v40  ;;  %1906 = vmatpush.bf16.msra.mxu0 %v1841_v5  ;;  %vm3548_vm5 = vmmov %vm3547_vm4 }
 0xbb0   : > { %v1828_v8 = vpop.permute.xlu1 %1827  ;;  %v1791_v42 = vpop.permute.xlu0 %1790 }
 0xbb1   : > { %v1796_v43 = vsel %vm3536_vm6, %v1791_v42, %v1793_v52  ;;  %v1830_v44 = vsel %vm574_vm8, %v1826_v39, %v1828_v8  ;;  %v1806_v50 = vpop.permute.xlu2 %1805  ;;  %vm3541_vm8 = vcmask 736256   ;;  %v1970_v42 = vld [vmem:[%s2580_s14 + $0x10] sm:$0xff] }
 0xbb2   : > { %1882 = vmatpush.bf16.msrb.mxu2 %v1796_v43  ;;  %1907 = vmatpush.bf16.msra.mxu0 %v1830_v44  ;;  %v1808_v53 = vsel %vm3539_vm7, %v1804_v26, %v1806_v50  ;;  %vm3544_vm10 = vmmov %vm3541_vm8 }
 0xbb8   : > { %v1817_v30 = vpop.permute.xlu1 %1816  ;;  %v1780_v45 = vpop.permute.xlu0 %1779 }
 0xbb9   : > { %v1785_v46 = vsel %vm3537_vm13, %v1780_v45, %v1782_v6  ;;  %v1819_v47 = vsel %vm3538_vm14, %v1815_v48, %v1817_v30  ;;  %v1773_v51 = vpop.permute.xlu2 %1772 }
 0xbba   : > { %1883 = vmatpush.bf16.msrb.mxu2 %v1785_v46  ;;  %1908 = vmatpush.bf16.msra.mxu0 %v1819_v47  ;;  %v1775_v1 = vsel %vm3546_vm12, %v1771_v41, %v1773_v51  ;;  %v1973_v47 = vld [vmem:[%s2580_s14 + $0x28] sm:$0xff]  ;;  %s2371_s14 = scalar_lea.hbm %s3551_s15, 96 }
 0xbbb   : > { %p2373_p4 = scmp.lt.s32.totalorder %s2371_s14, %s2367_s19 }
 0xbbd   : > { %p2374_p5 = por %p2373_p4, %p2372_p3 }
 0xbbe   : > { %1909 = vmatpush.bf16.msra.mxu0 %v1808_v53 }
 0xbbf   : > { %p2375_p7 = pnand %p2374_p5, %p2370_p2 }
 0xbc0   : > { %v1846_v56 = vpop.permute.xlu1 %1845  ;;  %v1769_v57 = vpop.permute.xlu0 %1768 }
 0xbc1   : > { %v1774_v59 = vsel %vm3540_vm15, %v1769_v57, %v1771_v41 }
 0xbc2   : > { %1884 = vmatpush.bf16.msrb.mxu2 %v1774_v59 }
 0xbc6   : > { %1885 = vmatpush.bf16.msrb.mxu2 %v3267_v18 }
 0xbc8   : > { %v1795_v14 = vpop.permute.xlu1 %1794  ;;  %v1848_v31 = vpop.permute.xlu0 %1847 }
 0xbc9   : > { %v1851_v33 = vsel %vm3541_vm8, %v1846_v56, %v1848_v31  ;;  %1886 = vmatmul.bf16.vlgmr.msrb.gmra.mxu2 %v2202_v61  ;;  %v1797_v37 = vsel %vm3542_vm0, %v1793_v52, %v1795_v14 }
 0xbca   : > { %1899 = vmatpush.bf16.msra.mxu3 %v1851_v33  ;;  %1910 = vmatpush.bf16.msra.mxu0 %v1797_v37 }
 0xbcd   : > { %2207 = vmatmul.msk.bf16.vlgmr.msra.gmra.mxu3 %vm3543_vm9, %v2206_v62 }
 0xbce   : > { %1934 = vmatpush.bf16.msrb.mxu3 %v1839_v63 }
 0xbd0   : > { %v1850_v9 = vpop.permute.xlu1 %1849  ;;  %v1784_v10 = vpop.permute.xlu0 %1783 }
 0xbd1   : > { %v1852_v54 = vsel %vm3544_vm10, %v1848_v31, %v1850_v9  ;;  %1955 = vmatpush.bf16.msra.mxu2 %v1850_v9  ;;  %v1786_v32 = vsel %vm3545_vm11, %v1782_v6, %v1784_v10 }
 0xbd2   : > { %1935 = vmatpush.bf16.msrb.mxu3 %v1828_v8  ;;  %1911 = vmatpush.bf16.msra.mxu0 %v1786_v32 }
 0xbd3   : > { %1927 = vmatpush.bf16.msrb.mxu1 %v1852_v54 }
 0xbd6   : > { %1936 = vmatpush.bf16.msrb.mxu3 %v1817_v30  ;;  %2208 = vmatmul.msk.bf16.vlgmr.msrb.gmra.mxu1 %vm3547_vm4, %v2206_v62 }
 0xbd7   : > { %1912 = vmatpush.bf16.msra.mxu0 %v1775_v1 }
 0xbd8   : > { %v1859_v3 = vpop.permute.xlu0 %1858 }
 0xbd9   : > { %2209 = vmatmul.msk.bf16.vlgmr.msra.gmra.mxu2 %vm3548_vm5, %v2206_v62 }
 0xbda   : > { %1937 = vmatpush.bf16.msrb.mxu3 %v1806_v50 }
 0xbdb   : > { %1913 = vmatpush.bf16.msra.mxu0 %v3269_v19  ;;  %v1864_v19 = vpop.permute.xlu2 %1863 }
 0xbde   : > { %1938 = vmatpush.bf16.msrb.mxu3 %v1795_v14  ;;  %1914 = vmatmul.bf16.vlgmr.msra.gmra.mxu0 %v2202_v61 }
 0xbe2   : > { %1939 = vmatpush.bf16.msrb.mxu3 %v1784_v10 }
 0xbe6   : > { %1940 = vmatpush.bf16.msrb.mxu3 %v1773_v51 }
 0xbea   : > { %1941 = vmatpush.bf16.msrb.mxu3 %v3283_v21 }
 0xbed   : > { %1942 = vmatmul.bf16.vlgmr.msrb.gmra.mxu3 %v2202_v61 }
 0xc4c   : > { %v1887_v2 = vpop.f32.mrf.mxu2 }
 0xc4d   : > { %v1888_v36 = vadd.f32 %v1887_v2, %v1859_v3 }
 0xc50   : > { %v1901_v11 = vpop.f32.mrf.mxu3 }
 0xc51   : > { %v1902_v12 = vadd.f32 %v1901_v11, %v1888_v36 }
 0xc53   : > { %v1962_v16 = vsel %vm2739_vm2, %v1902_v12, 0.0  ;;  %v1929_v21 = vpop.f32.mrf.mxu1 }
 0xc54   : > { %v1974_v17 = vadd.f32 %v1968_v27, %v1962_v16  ;;  %v1889_v18 = vpop.f32.mrf.mxu2 }
 0xc55   : > { %v1890_v13 = vadd.f32 %v1889_v18, %v1864_v19 }
 0xc56   : > { %1980 = vst [vmem:[%s3366_s30] sm:$0xff] %v1974_v17 }
 0xc58   : > { %v1903_v20 = vpop.f32.mrf.mxu3 }
 0xc59   : > { %v1904_v22 = vadd.f32 %v1903_v20, %v1890_v13 }
 0xc5b   : > { %v1915_v24 = vpop.f32.mrf.mxu0  ;;  %v1965_v25 = vsel %vm2739_vm2, %v1904_v22, 0.0  ;;  %v1931_v0 = vpop.f32.mrf.mxu1  ;;  %vm3550_vm2 = vcmask 556032  }
 0xc5c   : > { %v1916_v26 = vadd.f32 %v1915_v24, %v1859_v3  ;;  %v1977_v28 = vadd.f32 %v1971_v23, %v1965_v25  ;;  %v1957_v5 = vpop.f32.mrf.mxu2 }
 0xc5e   : > { %v1930_v29 = vadd.f32 %v1929_v21, %v1916_v26  ;;  %1983 = vst [vmem:[%s3366_s30 + $0x18] sm:$0xff] %v1977_v28 }
 0xc60   : > { %v1963_v52 = vsel %vm2735_vm1, %v1930_v29, 0.0 }
 0xc61   : > { %v1975_v48 = vadd.f32 %v1969_v34, %v1963_v52 }
 0xc63   : > { %1981 = vst [vmem:[%s3366_s30 + $0x8] sm:$0xff] %v1975_v48  ;;  %v1917_v39 = vpop.f32.mrf.mxu0 }
 0xc64   : > { %v1918_v6 = vadd.f32 %v1917_v39, %v1864_v19  ;;  %v1959_v45 = vpop.f32.mrf.mxu2 }
 0xc66   : > { %v1932_v7 = vadd.f32 %v1931_v0, %v1918_v6 }
 0xc68   : > { %v1966_v63 = vsel %vm2735_vm1, %v1932_v7, 0.0  ;;  %vm3553_vm1 = vmmov %vm3550_vm2 }
 0xc69   : > { %v1978_v4 = vadd.f32 %v1972_v38, %v1966_v63 }
 0xc6b   : > { %1984 = vst [vmem:[%s3366_s30 + $0x20] sm:$0xff] %v1978_v4 }
 0xc70   : > { %v1943_v40 = vpop.f32.mrf.mxu3 }
 0xc71   : > { %v1944_v41 = vadd.f32 %v1943_v40, %v1859_v3 }
 0xc73   : > { %v1958_v8 = vadd.f32 %v1957_v5, %v1944_v41 }
 0xc75   : > { %v1964_v43 = vsel %vm2748_vm3, %v1958_v8, 0.0 }
 0xc76   : > { %v1976_v44 = vadd.f32 %v1970_v42, %v1964_v43 }
 0xc78   : > { %1982 = vst.msk [vmem:[%s3366_s30 + $0x10] sm:$0xff] %vm3550_vm2, %v1976_v44  ;;  %v1945_v30 = vpop.f32.mrf.mxu3 }
 0xc79   : > { %v1946_v35 = vadd.f32 %v1945_v30, %v1864_v19 }
 0xc7b   : > { %v1960_v46 = vadd.f32 %v1959_v45, %v1946_v35 }
 0xc7d   : > { %v1967_v50 = vsel %vm2748_vm3, %v1960_v46, 0.0 }
 0xc7e   : > { %v1979_v53 = vadd.f32 %v1973_v47, %v1967_v50 }
 0xc80   : > { %1985 = vst.msk [vmem:[%s3366_s30 + $0x28] sm:$0xff] %vm3553_vm1, %v1979_v53 }
 0xc81   : > { %2378 = shalt.err (!%p2375_p7)
}
 0xc82   : > { %s2431_s18 = smov 384   ;;  %s2432_s30 = smov 24  }
 0xc83   : > { %2244 = dma.vmem_to_hbm [thread:$0]  (%p2544_p11), %s2000_s26, 768, %s2002_s25, %s1987_s17, %s2431_s18, %s2431_s18, %s2432_s30  }
 0xc84 PF: > { %s3554_s13 = sld [smem:[#allocation9_spill]]  ;;  %p2251_p8 = pnand %p2077_p9, %p2548_p12 }
 0xc86   : > { %p2252_p10 = pneg %p2251_p8 }
 0xc8a   : > { %s2016_s16 = sand.u32 1, %s3554_s13  }
 0xc8b   : > { %s2017_s23 = scalar_lea.sflag [#allocation5], %s2016_s16 }
 0xc8c   : > { %2400 = dma.done.wait (%p2252_p10), %s2017_s23, 768  }
 0xc8d   : > { %2402 = vsyncadd (%p2252_p10), %s2017_s23, 4294966528  ;;  %s3556_s24 = sld [smem:[#allocation11_spill]]  ;;  %s3559_s21 = smov %s2409_s22 }
 0xc8e   : > { %s3557_s12 = sld [smem:[#allocation10_spill]] }
 0xc8f   : > { %s3558_s23 = sld [smem:[#allocation12_spill]] }
 0xc93   : > { %p25_p0 = scmp.ge.s32.totalorder %s3556_s24, 4  }
 0xc94   : > { %s3560_s22 = smov %s3557_s12 }
 0xc95   :  { %27 = sbr.rel (!%p25_p0) target bundleno = 7 (0x7), region = 121 }
 0xc9a   :  { %2023 = vsyncpa [#allocation4], 1 }
 0xc9b   :  { %2025 = vsyncpa [#allocation4 + $0x1], 1 }
 0xc9c   :  { %2026 = vsyncpa [#allocation5], 1 }
 0xc9d   :  { %2028 = vsyncpa [#allocation5 + $0x1], 1 }

</bundles_post_ra>
